<compile_context>
chip_gen: v6e
topology: v6e:2x2x1
jax: 0.10.0
libtpu: 0.0.40
codegen_flags: <defaults>
</compile_context>

<pallas_src>
import functools

import numpy as np
import jax
import jax.numpy as jnp
from jax.experimental import pallas as pl
from jax.experimental.pallas import tpu as pltpu


# --------------------------- roll-direction probe ----------------------------
# pltpu.roll lowers to a single XLU rotate; we probe its shift convention once
# on-device (cached) so the stencil is correct regardless of convention, and
# fall back to concat-based shifts if roll cannot be used for this shape.
_ROLL_DIR_CACHE = {}


def _probe_roll_direction(w, c, dtype):
    key = (int(w), int(c), jnp.dtype(dtype).name)
    if key in _ROLL_DIR_CACHE:
        return _ROLL_DIR_CACHE[key]
    direction = None
    try:
        def probe(x_ref, o_ref):
            o_ref[...] = pltpu.roll(x_ref[...], 1, axis=1)

        ramp = jnp.broadcast_to(
            jnp.arange(w, dtype=dtype)[None, :, None], (2, w, c))
        out = pl.pallas_call(
            probe, out_shape=jax.ShapeDtypeStruct((2, w, c), dtype))(ramp)
        out = np.asarray(jax.block_until_ready(out))
        ref = np.asarray(ramp)
        if np.array_equal(out, np.roll(ref, 1, axis=1)):
            direction = +1      # roll(v, 1, axis) == v[w-1]  (np.roll convention)
        elif np.array_equal(out, np.roll(ref, -1, axis=1)):
            direction = -1      # flipped convention: left neighbour needs shift W-1
    except Exception:
        direction = None        # roll unavailable -> concat fallback
    _ROLL_DIR_CACHE[key] = direction
    return direction


# --------------------------------- kernel ------------------------------------

def _upsample2x_kernel(x_ref, xup_ref, xdn_ref, o_ref, *, roll_dir):
    # x_ref   : (1, th, W, C)   rows [i*th, i*th+th) of the input image
    # xup_ref : (1, 1,  W, C)   row max(i*th-1, 0)        (top halo, clamped)
    # xdn_ref : (1, 1,  W, C)   row min(i*th+th, H-1)     (bottom halo, clamped)
    # o_ref   : (1, th, 2, W, 2C)  == rows [2*i*th, 2*(i*th+th)) of (N,2H,2W,C)
    odt = o_ref.dtype
    # bf16 compute for bf16 inputs (exact {0.25,0.75} weights), f32 otherwise.
    # TODO(synk): on v5e (no bf16 VPU) f32 compute would be marginally faster.
    cdt = jnp.bfloat16 if o_ref.dtype == jnp.bfloat16 else jnp.float32

    th, wdim, c = x_ref.shape[1], x_ref.shape[2], x_ref.shape[3]

    x = x_ref[0].astype(cdt)      # (th, W, C)
    xu = xup_ref[0].astype(cdt)   # (1,  W, C)
    xd = xdn_ref[0].astype(cdt)   # (1,  W, C)

    # Boundary masks for the width stencil (full-lane iota: no lane broadcast).
    col = jax.lax.broadcasted_iota(jnp.int32, (1, wdim, c), 1)
    first_col = col == 0
    last_col = col == wdim - 1

    def width_stage(v):
        # v: (R, W, C) -> (even-col, odd-col) interpolants, both (R, W, C).
        #   even output col 2w   = 0.25 * v[:, w-1] + 0.75 * v[:, w]   (clamped)
        #   odd  output col 2w+1 = 0.75 * v[:, w]   + 0.25 * v[:, w+1] (clamped)
        if roll_dir is None:
            v_l = jnp.concatenate([v[:, :1], v[:, :-1]], axis=1)
            v_r = jnp.concatenate([v[:, 1:], v[:, -1:]], axis=1)
        else:
            lshift = 1 if roll_dir > 0 else wdim - 1   # shift giving v[:, w-1]
            rshift = wdim - lshift                     # shift giving v[:, w+1]
            v_l = jnp.where(first_col, v, pltpu.roll(v, lshift, axis=1))
            v_r = jnp.where(last_col, v, pltpu.roll(v, rshift, axis=1))
        return 0.25 * v_l + 0.75 * v, 0.75 * v + 0.25 * v_r

    we_m, wo_m = width_stage(x)    # (th, W, C)
    we_u, wo_u = width_stage(xu)   # (1,  W, C)
    we_d, wo_d = width_stage(xd)   # (1,  W, C)

    # ---- height stage, written directly into the four output slabs ----------
    # even output rows (sub-row 0): 0.25 * prev_row + 0.75 * this_row
    o_ref[0, 0, 0, :, 0:c] = (0.25 * we_u[0] + 0.75 * we_m[0]).astype(odt)
    o_ref[0, 0, 0, :, c:2 * c] = (0.25 * wo_u[0] + 0.75 * wo_m[0]).astype(odt)
    o_ref[0, 1:th, 0, :, 0:c] = (
        0.25 * we_m[0:th - 1] + 0.75 * we_m[1:th]).astype(odt)
    o_ref[0, 1:th, 0, :, c:2 * c] = (
        0.25 * wo_m[0:th - 1] + 0.75 * wo_m[1:th]).astype(odt)
    # odd output rows (sub-row 1): 0.75 * this_row + 0.25 * next_row
    o_ref[0, 0:th - 1, 1, :, 0:c] = (
        0.75 * we_m[0:th - 1] + 0.25 * we_m[1:th]).astype(odt)
    o_ref[0, 0:th - 1, 1, :, c:2 * c] = (
        0.75 * wo_m[0:th - 1] + 0.25 * wo_m[1:th]).astype(odt)
    o_ref[0, th - 1, 1, :, 0:c] = (
        0.75 * we_m[th - 1] + 0.25 * we_d[0]).astype(odt)
    o_ref[0, th - 1, 1, :, c:2 * c] = (
        0.75 * wo_m[th - 1] + 0.25 * wo_d[0]).astype(odt)


# --------------------------------- wrapper -----------------------------------

def _pick_th(n, h, w, c, itemsize):
    """H-tile size: a divisor of h (>=2), output block <= ~4 MiB, and (when
    possible) an even total tile count so both v7x TensorCores are fed."""
    divisors = [d for d in range(2, h + 1) if h % d == 0]
    if not divisors:
        return h
    out_tile_bytes = lambda t: 4 * t * w * c * itemsize   # (t,2,W,2C) block
    budget = 4 << 20
    fitting = [d for d in divisors if out_tile_bytes(d) <= budget] or [divisors[0]]
    th = fitting[-1]
    n_tiles = lambda t: n * (h // t)
    if n_tiles(th) < 2:                       # expose >= 2 parallel tiles
        smaller = [d for d in fitting if h // d >= 2]
        if smaller:
            th = smaller[-1]
    if n_tiles(th) % 2 == 1:                  # prefer an even total tile count
        even = [d for d in fitting if n_tiles(d) % 2 == 0]
        if even:
            th = even[-1]
    return th


def upsample_att(x: jax.Array, scale_factor: int = 2, mode: str = "bilinear",
                 align_corners: bool = False) -> jax.Array:
    """x: (N, H, W, C) -> (N, 2H, 2W, C), bilinear, align_corners=False."""
    assert mode == "bilinear" and scale_factor == 2 and not align_corners, (
        "kernel is specialized to the module's configuration "
        "(scale_factor=2, mode='bilinear', align_corners=False)")
    n, h, w, c = x.shape
    assert h >= 2 and w >= 2, "spatial dims must be >= 2"
    itemsize = jnp.dtype(x.dtype).itemsize

    th = _pick_th(n, h, w, c, itemsize)
    n_th = h // th
    roll_dir = _probe_roll_direction(w, c, x.dtype)

    # VMEM: double-buffered blocks (tile + 2 halo rows in, (th,2,W,2C) out)
    # plus stencil temporaries, with headroom; within physical VMEM everywhere.
    cbytes = 2 if x.dtype == jnp.bfloat16 else 4
    block_bytes = ((th + 2) * w * c + 4 * th * w * c) * itemsize
    temp_bytes = 10 * th * w * c * cbytes
    vmem_limit = int(min(max(2 * block_bytes + temp_bytes + (2 << 20), 32 << 20),
                         48 << 20))

    cost = pl.CostEstimate(
        flops=int(18 * n * h * w * c),                       # both stencil stages (VPU)
        transcendentals=0,
        bytes_accessed=int((5 * n * h * w * c                # read X, write 4X
                            + 2 * n * n_th * w * c) * itemsize),   # halo rows
    )

    kernel = functools.partial(_upsample2x_kernel, roll_dir=roll_dir)

    # Output produced as (N, H, 2, W, 2C): bit-identical HBM layout to
    # (N, 2H, 2W, C), so the final reshape is a free bitcast (no extra pass).
    out5 = pl.pallas_call(
        kernel,
        out_shape=jax.ShapeDtypeStruct((n, h, 2, w, 2 * c), x.dtype),
        grid_spec=pltpu.PrefetchScalarGridSpec(
            num_scalar_prefetch=0,
            grid=(n, n_th),
            in_specs=[
                # main tile: th rows
                pl.BlockSpec((1, th, w, c), lambda b, i: (b, i, 0, 0)),
                # 1-row top halo (clamped)
                pl.BlockSpec((1, 1, w, c),
                             lambda b, i: (b, jnp.maximum(i * th - 1, 0), 0, 0)),
                # 1-row bottom halo (clamped)
                pl.BlockSpec((1, 1, w, c),
                             lambda b, i: (b, jnp.minimum(i * th + th, h - 1), 0, 0)),
            ],
            out_specs=pl.BlockSpec((1, th, 2, w, 2 * c),
                                   lambda b, i: (b, i, 0, 0, 0)),
        ),
        compiler_params=pltpu.CompilerParams(
            dimension_semantics=("parallel", "parallel"),
            vmem_limit_bytes=vmem_limit),
        cost_estimate=cost,
    )(x, x, x)
    return out5.reshape(n, 2 * h, 2 * w, c)


# ------------------------------- reference -----------------------------------

def _pt_bilinear_matrix(in_size, out_size, scale_factor, align_corners):
    """(out_size, in_size) 1-D linear-interp matrix matching F.interpolate."""
    o = np.arange(out_size, dtype=np.float64)
    if align_corners:
        src = o * (in_size - 1) / (out_size - 1) if out_size > 1 else np.zeros_like(o)
    else:
        src = (o + 0.5) / float(scale_factor) - 0.5
        src = np.maximum(src, 0.0)
    i0 = np.minimum(np.floor(src).astype(np.int64), in_size - 1)
    i1 = np.minimum(i0 + 1, in_size - 1)
    lam = src - i0
    m = np.zeros((out_size, in_size), dtype=np.float64)
    m[np.arange(out_size), i0] += 1.0 - lam
    m[np.arange(out_size), i1] += lam
    return m


def _reference(x, scale_factor, align_corners):
    """Pure numpy reference in float64 (matches torch F.interpolate bilinear)."""
    n, h, w, c = x.shape
    ho, wo = h * scale_factor, w * scale_factor
    wh = _pt_bilinear_matrix(h, ho, scale_factor, align_corners)
    ww = _pt_bilinear_matrix(w, wo, scale_factor, align_corners)
    out = np.einsum("oh,nhwc->nowc", wh, x.astype(np.float64))
    out = np.einsum("pw,nowc->nopc", ww, out)
    return out.astype(x.dtype)


if __name__ == "__main__":
    key = jax.random.PRNGKey(0)

    # P5-like small shape: C = conv_dims (lane-dense multiple of 128).
    N, H, W, C = 2, 16, 16, 128
    x = jax.random.normal(key, (N, H, W, C), dtype=jnp.float32)
    y = jax.block_until_ready(upsample_att(x))
    assert y.shape == (N, 2 * H, 2 * W, C), y.shape
    y_ref = _reference(np.asarray(x), scale_factor=2, align_corners=False)
    np.testing.assert_allclose(np.asarray(y), y_ref, rtol=1e-5, atol=1e-5)

    # Second shape exercising the H-tiled (multi-tile, halo) path.
    N2, H2, W2, C2 = 1, 32, 16, 128
    x2 = jax.random.normal(jax.random.PRNGKey(1), (N2, H2, W2, C2),
                           dtype=jnp.float32)
    y2 = jax.block_until_ready(upsample_att(x2))
    assert y2.shape == (N2, 2 * H2, 2 * W2, C2), y2.shape
    y2_ref = _reference(np.asarray(x2), scale_factor=2, align_corners=False)
    np.testing.assert_allclose(np.asarray(y2), y2_ref, rtol=1e-5, atol=1e-5)

    print("KERNEL_OK")
</pallas_src>

<mosaic_0001>
module attributes {stable_mosaic.version = 11 : i64} {
  func.func @probe(%arg0: memref<2x16x128xf32, #tpu.memory_space<vmem>>, %arg1: memref<2x16x128xf32, #tpu.memory_space<vmem>>) attributes {dimension_semantics = [], scalar_prefetch = 0 : i64, scratch_operands = 0 : i64, tpu.core_type = #tpu.core_type<tc>} {
    %c0 = arith.constant 0 : index
    %c0_0 = arith.constant 0 : index
    %c0_1 = arith.constant 0 : index
    %0 = vector.load %arg0[%c0, %c0_0, %c0_1] : memref<2x16x128xf32, #tpu.memory_space<vmem>>, vector<2x16x128xf32>
    %c1_i32 = arith.constant 1 : i32
    %1 = tpu.dynamic_rotate %0 by %c1_i32 dim 1 : vector<2x16x128xf32>, i32 -> vector<2x16x128xf32>
    %c0_2 = arith.constant 0 : index
    %c0_3 = arith.constant 0 : index
    %c0_4 = arith.constant 0 : index
    %2 = vector.load %arg1[%c0_2, %c0_3, %c0_4] : memref<2x16x128xf32, #tpu.memory_space<vmem>>, vector<2x16x128xf32>
    tpu.vector_store %arg1[%c0_2, %c0_3, %c0_4], %1 {strides = array<i32>} : memref<2x16x128xf32, #tpu.memory_space<vmem>>, vector<2x16x128xf32>,
    return
  }
}

module attributes {stable_mosaic.version = 11 : i64} {
  func.func @_upsample2x_kernel(%arg0: i32, %arg1: i32, %arg2: memref<1x16x16x128xf32, #tpu.memory_space<vmem>>, %arg3: memref<1x1x16x128xf32, #tpu.memory_space<vmem>>, %arg4: memref<1x1x16x128xf32, #tpu.memory_space<vmem>>, %arg5: memref<1x16x2x16x256xf32, #tpu.memory_space<vmem>>) attributes {dimension_semantics = [#tpu.dimension_semantics<parallel>, #tpu.dimension_semantics<parallel>], iteration_bounds = array<i64: 2, 1>, scalar_prefetch = 0 : i64, scratch_operands = 0 : i64, tpu.core_type = #tpu.core_type<tc>, window_params = [{transform_indices = @transform_0, window_bounds = array<i64: 1, 16, 16, 128>}, {transform_indices = @transform_1, window_bounds = array<i64: 1, 1, 16, 128>}, {transform_indices = @transform_2, window_bounds = array<i64: 1, 1, 16, 128>}, {transform_indices = @transform_3, window_bounds = array<i64: 1, 16, 2, 16, 256>}]} {
    %c0 = arith.constant 0 : index
    %c0_0 = arith.constant 0 : index
    %c0_1 = arith.constant 0 : index
    %c0_2 = arith.constant 0 : index
    %0 = vector.load %arg2[%c0, %c0_0, %c0_1, %c0_2] : memref<1x16x16x128xf32, #tpu.memory_space<vmem>>, vector<1x16x16x128xf32>
    %1 = vector.shape_cast %0 : vector<1x16x16x128xf32> to vector<16x16x128xf32>
    %c0_3 = arith.constant 0 : index
    %c0_4 = arith.constant 0 : index
    %c0_5 = arith.constant 0 : index
    %c0_6 = arith.constant 0 : index
    %2 = vector.load %arg3[%c0_3, %c0_4, %c0_5, %c0_6] : memref<1x1x16x128xf32, #tpu.memory_space<vmem>>, vector<1x1x16x128xf32>
    %3 = vector.shape_cast %2 : vector<1x1x16x128xf32> to vector<1x16x128xf32>
    %c0_7 = arith.constant 0 : index
    %c0_8 = arith.constant 0 : index
    %c0_9 = arith.constant 0 : index
    %c0_10 = arith.constant 0 : index
    %4 = vector.load %arg4[%c0_7, %c0_8, %c0_9, %c0_10] : memref<1x1x16x128xf32, #tpu.memory_space<vmem>>, vector<1x1x16x128xf32>
    %5 = vector.shape_cast %4 : vector<1x1x16x128xf32> to vector<1x16x128xf32>
    %6 = vector.extract_strided_slice %1 {offsets = [0, 0, 0], sizes = [16, 1, 128], strides = [1, 1, 1]} : vector<16x16x128xf32> to vector<16x1x128xf32>
    %7 = vector.extract_strided_slice %1 {offsets = [0, 0, 0], sizes = [16, 15, 128], strides = [1, 1, 1]} : vector<16x16x128xf32> to vector<16x15x128xf32>
    %8 = tpu.concatenate %6, %7 in 1 : vector<16x1x128xf32>, vector<16x15x128xf32> -> vector<16x16x128xf32>
    %9 = vector.extract_strided_slice %1 {offsets = [0, 1, 0], sizes = [16, 15, 128], strides = [1, 1, 1]} : vector<16x16x128xf32> to vector<16x15x128xf32>
    %10 = vector.extract_strided_slice %1 {offsets = [0, 15, 0], sizes = [16, 1, 128], strides = [1, 1, 1]} : vector<16x16x128xf32> to vector<16x1x128xf32>
    %11 = tpu.concatenate %9, %10 in 1 : vector<16x15x128xf32>, vector<16x1x128xf32> -> vector<16x16x128xf32>
    %cst = arith.constant 2.500000e-01 : f32
    %12 = vector.broadcast %cst : f32 to vector<16x16x128xf32>
    %13 = arith.mulf %12, %8 : vector<16x16x128xf32>
    %cst_11 = arith.constant 7.500000e-01 : f32
    %14 = vector.broadcast %cst_11 : f32 to vector<16x16x128xf32>
    %15 = arith.mulf %14, %1 : vector<16x16x128xf32>
    %16 = arith.addf %13, %15 : vector<16x16x128xf32>
    %cst_12 = arith.constant 7.500000e-01 : f32
    %17 = vector.broadcast %cst_12 : f32 to vector<16x16x128xf32>
    %18 = arith.mulf %17, %1 : vector<16x16x128xf32>
    %cst_13 = arith.constant 2.500000e-01 : f32
    %19 = vector.broadcast %cst_13 : f32 to vector<16x16x128xf32>
    %20 = arith.mulf %19, %11 : vector<16x16x128xf32>
    %21 = arith.addf %18, %20 : vector<16x16x128xf32>
    %22 = vector.extract_strided_slice %3 {offsets = [0, 0, 0], sizes = [1, 1, 128], strides = [1, 1, 1]} : vector<1x16x128xf32> to vector<1x1x128xf32>
    %23 = vector.extract_strided_slice %3 {offsets = [0, 0, 0], sizes = [1, 15, 128], strides = [1, 1, 1]} : vector<1x16x128xf32> to vector<1x15x128xf32>
    %24 = tpu.concatenate %22, %23 in 1 : vector<1x1x128xf32>, vector<1x15x128xf32> -> vector<1x16x128xf32>
    %25 = vector.extract_strided_slice %3 {offsets = [0, 1, 0], sizes = [1, 15, 128], strides = [1, 1, 1]} : vector<1x16x128xf32> to vector<1x15x128xf32>
    %26 = vector.extract_strided_slice %3 {offsets = [0, 15, 0], sizes = [1, 1, 128], strides = [1, 1, 1]} : vector<1x16x128xf32> to vector<1x1x128xf32>
    %27 = tpu.concatenate %25, %26 in 1 : vector<1x15x128xf32>, vector<1x1x128xf32> -> vector<1x16x128xf32>
    %cst_14 = arith.constant 2.500000e-01 : f32
    %28 = vector.broadcast %cst_14 : f32 to vector<1x16x128xf32>
    %29 = arith.mulf %28, %24 : vector<1x16x128xf32>
    %cst_15 = arith.constant 7.500000e-01 : f32
    %30 = vector.broadcast %cst_15 : f32 to vector<1x16x128xf32>
    %31 = arith.mulf %30, %3 : vector<1x16x128xf32>
    %32 = arith.addf %29, %31 : vector<1x16x128xf32>
    %cst_16 = arith.constant 7.500000e-01 : f32
    %33 = vector.broadcast %cst_16 : f32 to vector<1x16x128xf32>
    %34 = arith.mulf %33, %3 : vector<1x16x128xf32>
    %cst_17 = arith.constant 2.500000e-01 : f32
    %35 = vector.broadcast %cst_17 : f32 to vector<1x16x128xf32>
    %36 = arith.mulf %35, %27 : vector<1x16x128xf32>
    %37 = arith.addf %34, %36 : vector<1x16x128xf32>
    %38 = vector.extract_strided_slice %5 {offsets = [0, 0, 0], sizes = [1, 1, 128], strides = [1, 1, 1]} : vector<1x16x128xf32> to vector<1x1x128xf32>
    %39 = vector.extract_strided_slice %5 {offsets = [0, 0, 0], sizes = [1, 15, 128], strides = [1, 1, 1]} : vector<1x16x128xf32> to vector<1x15x128xf32>
    %40 = tpu.concatenate %38, %39 in 1 : vector<1x1x128xf32>, vector<1x15x128xf32> -> vector<1x16x128xf32>
    %41 = vector.extract_strided_slice %5 {offsets = [0, 1, 0], sizes = [1, 15, 128], strides = [1, 1, 1]} : vector<1x16x128xf32> to vector<1x15x128xf32>
    %42 = vector.extract_strided_slice %5 {offsets = [0, 15, 0], sizes = [1, 1, 128], strides = [1, 1, 1]} : vector<1x16x128xf32> to vector<1x1x128xf32>
    %43 = tpu.concatenate %41, %42 in 1 : vector<1x15x128xf32>, vector<1x1x128xf32> -> vector<1x16x128xf32>
    %cst_18 = arith.constant 2.500000e-01 : f32
    %44 = vector.broadcast %cst_18 : f32 to vector<1x16x128xf32>
    %45 = arith.mulf %44, %40 : vector<1x16x128xf32>
    %cst_19 = arith.constant 7.500000e-01 : f32
    %46 = vector.broadcast %cst_19 : f32 to vector<1x16x128xf32>
    %47 = arith.mulf %46, %5 : vector<1x16x128xf32>
    %48 = arith.addf %45, %47 : vector<1x16x128xf32>
    %cst_20 = arith.constant 7.500000e-01 : f32
    %49 = vector.broadcast %cst_20 : f32 to vector<1x16x128xf32>
    %50 = arith.mulf %49, %5 : vector<1x16x128xf32>
    %cst_21 = arith.constant 2.500000e-01 : f32
    %51 = vector.broadcast %cst_21 : f32 to vector<1x16x128xf32>
    %52 = arith.mulf %51, %43 : vector<1x16x128xf32>
    %53 = arith.addf %50, %52 : vector<1x16x128xf32>
    %54 = vector.shape_cast %32 : vector<1x16x128xf32> to vector<16x128xf32>
    %cst_22 = arith.constant 2.500000e-01 : f32
    %55 = vector.broadcast %cst_22 : f32 to vector<16x128xf32>
    %56 = arith.mulf %55, %54 : vector<16x128xf32>
    %57 = vector.extract_strided_slice %16 {offsets = [0, 0, 0], sizes = [1, 16, 128], strides = [1, 1, 1]} : vector<16x16x128xf32> to vector<1x16x128xf32>
    %58 = vector.shape_cast %57 : vector<1x16x128xf32> to vector<16x128xf32>
    %cst_23 = arith.constant 7.500000e-01 : f32
    %59 = vector.broadcast %cst_23 : f32 to vector<16x128xf32>
    %60 = arith.mulf %59, %58 : vector<16x128xf32>
    %61 = arith.addf %56, %60 : vector<16x128xf32>
    %c0_24 = arith.constant 0 : index
    %c0_25 = arith.constant 0 : index
    %c0_26 = arith.constant 0 : index
    %c0_27 = arith.constant 0 : index
    %c0_28 = arith.constant 0 : index
    %62 = vector.load %arg5[%c0_24, %c0_25, %c0_26, %c0_27, %c0_28] : memref<1x16x2x16x256xf32, #tpu.memory_space<vmem>>, vector<1x1x1x16x128xf32>
    %63 = vector.shape_cast %62 : vector<1x1x1x16x128xf32> to vector<16x128xf32>
    %64 = vector.shape_cast %61 : vector<16x128xf32> to vector<1x1x1x16x128xf32>
    tpu.vector_store %arg5[%c0_24, %c0_25, %c0_26, %c0_27, %c0_28], %64 {strides = array<i32>} : memref<1x16x2x16x256xf32, #tpu.memory_space<vmem>>, vector<1x1x1x16x128xf32>,
    %65 = vector.shape_cast %37 : vector<1x16x128xf32> to vector<16x128xf32>
    %cst_29 = arith.constant 2.500000e-01 : f32
    %66 = vector.broadcast %cst_29 : f32 to vector<16x128xf32>
    %67 = arith.mulf %66, %65 : vector<16x128xf32>
    %68 = vector.extract_strided_slice %21 {offsets = [0, 0, 0], sizes = [1, 16, 128], strides = [1, 1, 1]} : vector<16x16x128xf32> to vector<1x16x128xf32>
    %69 = vector.shape_cast %68 : vector<1x16x128xf32> to vector<16x128xf32>
    %cst_30 = arith.constant 7.500000e-01 : f32
    %70 = vector.broadcast %cst_30 : f32 to vector<16x128xf32>
    %71 = arith.mulf %70, %69 : vector<16x128xf32>
    %72 = arith.addf %67, %71 : vector<16x128xf32>
    %c0_31 = arith.constant 0 : index
    %c0_32 = arith.constant 0 : index
    %c0_33 = arith.constant 0 : index
    %c0_34 = arith.constant 0 : index
    %c128 = arith.constant 128 : index
    %73 = vector.load %arg5[%c0_31, %c0_32, %c0_33, %c0_34, %c128] : memref<1x16x2x16x256xf32, #tpu.memory_space<vmem>>, vector<1x1x1x16x128xf32>
    %74 = vector.shape_cast %73 : vector<1x1x1x16x128xf32> to vector<16x128xf32>
    %75 = vector.shape_cast %72 : vector<16x128xf32> to vector<1x1x1x16x128xf32>
    tpu.vector_store %arg5[%c0_31, %c0_32, %c0_33, %c0_34, %c128], %75 {strides = array<i32>} : memref<1x16x2x16x256xf32, #tpu.memory_space<vmem>>, vector<1x1x1x16x128xf32>,
    %76 = vector.extract_strided_slice %16 {offsets = [0, 0, 0], sizes = [15, 16, 128], strides = [1, 1, 1]} : vector<16x16x128xf32> to vector<15x16x128xf32>
    %cst_35 = arith.constant 2.500000e-01 : f32
    %77 = vector.broadcast %cst_35 : f32 to vector<15x16x128xf32>
    %78 = arith.mulf %77, %76 : vector<15x16x128xf32>
    %79 = vector.extract_strided_slice %16 {offsets = [1, 0, 0], sizes = [15, 16, 128], strides = [1, 1, 1]} : vector<16x16x128xf32> to vector<15x16x128xf32>
    %cst_36 = arith.constant 7.500000e-01 : f32
    %80 = vector.broadcast %cst_36 : f32 to vector<15x16x128xf32>
    %81 = arith.mulf %80, %79 : vector<15x16x128xf32>
    %82 = arith.addf %78, %81 : vector<15x16x128xf32>
    %c0_37 = arith.constant 0 : index
    %c1 = arith.constant 1 : index
    %c0_38 = arith.constant 0 : index
    %c0_39 = arith.constant 0 : index
    %c0_40 = arith.constant 0 : index
    %83 = vector.load %arg5[%c0_37, %c1, %c0_38, %c0_39, %c0_40] : memref<1x16x2x16x256xf32, #tpu.memory_space<vmem>>, vector<1x15x1x16x128xf32>
    %84 = vector.shape_cast %83 : vector<1x15x1x16x128xf32> to vector<15x16x128xf32>
    %85 = vector.shape_cast %82 : vector<15x16x128xf32> to vector<1x15x1x16x128xf32>
    tpu.vector_store %arg5[%c0_37, %c1, %c0_38, %c0_39, %c0_40], %85 {strides = array<i32>} : memref<1x16x2x16x256xf32, #tpu.memory_space<vmem>>, vector<1x15x1x16x128xf32>,
    %86 = vector.extract_strided_slice %21 {offsets = [0, 0, 0], sizes = [15, 16, 128], strides = [1, 1, 1]} : vector<16x16x128xf32> to vector<15x16x128xf32>
    %cst_41 = arith.constant 2.500000e-01 : f32
    %87 = vector.broadcast %cst_41 : f32 to vector<15x16x128xf32>
    %88 = arith.mulf %87, %86 : vector<15x16x128xf32>
    %89 = vector.extract_strided_slice %21 {offsets = [1, 0, 0], sizes = [15, 16, 128], strides = [1, 1, 1]} : vector<16x16x128xf32> to vector<15x16x128xf32>
    %cst_42 = arith.constant 7.500000e-01 : f32
    %90 = vector.broadcast %cst_42 : f32 to vector<15x16x128xf32>
    %91 = arith.mulf %90, %89 : vector<15x16x128xf32>
    %92 = arith.addf %88, %91 : vector<15x16x128xf32>
    %c0_43 = arith.constant 0 : index
    %c1_44 = arith.constant 1 : index
    %c0_45 = arith.constant 0 : index
    %c0_46 = arith.constant 0 : index
    %c128_47 = arith.constant 128 : index
    %93 = vector.load %arg5[%c0_43, %c1_44, %c0_45, %c0_46, %c128_47] : memref<1x16x2x16x256xf32, #tpu.memory_space<vmem>>, vector<1x15x1x16x128xf32>
    %94 = vector.shape_cast %93 : vector<1x15x1x16x128xf32> to vector<15x16x128xf32>
    %95 = vector.shape_cast %92 : vector<15x16x128xf32> to vector<1x15x1x16x128xf32>
    tpu.vector_store %arg5[%c0_43, %c1_44, %c0_45, %c0_46, %c128_47], %95 {strides = array<i32>} : memref<1x16x2x16x256xf32, #tpu.memory_space<vmem>>, vector<1x15x1x16x128xf32>,
    %96 = vector.extract_strided_slice %16 {offsets = [0, 0, 0], sizes = [15, 16, 128], strides = [1, 1, 1]} : vector<16x16x128xf32> to vector<15x16x128xf32>
    %cst_48 = arith.constant 7.500000e-01 : f32
    %97 = vector.broadcast %cst_48 : f32 to vector<15x16x128xf32>
    %98 = arith.mulf %97, %96 : vector<15x16x128xf32>
    %99 = vector.extract_strided_slice %16 {offsets = [1, 0, 0], sizes = [15, 16, 128], strides = [1, 1, 1]} : vector<16x16x128xf32> to vector<15x16x128xf32>
    %cst_49 = arith.constant 2.500000e-01 : f32
    %100 = vector.broadcast %cst_49 : f32 to vector<15x16x128xf32>
    %101 = arith.mulf %100, %99 : vector<15x16x128xf32>
    %102 = arith.addf %98, %101 : vector<15x16x128xf32>
    %c0_50 = arith.constant 0 : index
    %c0_51 = arith.constant 0 : index
    %c1_52 = arith.constant 1 : index
    %c0_53 = arith.constant 0 : index
    %c0_54 = arith.constant 0 : index
    %103 = vector.load %arg5[%c0_50, %c0_51, %c1_52, %c0_53, %c0_54] : memref<1x16x2x16x256xf32, #tpu.memory_space<vmem>>, vector<1x15x1x16x128xf32>
    %104 = vector.shape_cast %103 : vector<1x15x1x16x128xf32> to vector<15x16x128xf32>
    %105 = vector.shape_cast %102 : vector<15x16x128xf32> to vector<1x15x1x16x128xf32>
    tpu.vector_store %arg5[%c0_50, %c0_51, %c1_52, %c0_53, %c0_54], %105 {strides = array<i32>} : memref<1x16x2x16x256xf32, #tpu.memory_space<vmem>>, vector<1x15x1x16x128xf32>,
    %106 = vector.extract_strided_slice %21 {offsets = [0, 0, 0], sizes = [15, 16, 128], strides = [1, 1, 1]} : vector<16x16x128xf32> to vector<15x16x128xf32>
    %cst_55 = arith.constant 7.500000e-01 : f32
    %107 = vector.broadcast %cst_55 : f32 to vector<15x16x128xf32>
    %108 = arith.mulf %107, %106 : vector<15x16x128xf32>
    %109 = vector.extract_strided_slice %21 {offsets = [1, 0, 0], sizes = [15, 16, 128], strides = [1, 1, 1]} : vector<16x16x128xf32> to vector<15x16x128xf32>
    %cst_56 = arith.constant 2.500000e-01 : f32
    %110 = vector.broadcast %cst_56 : f32 to vector<15x16x128xf32>
    %111 = arith.mulf %110, %109 : vector<15x16x128xf32>
    %112 = arith.addf %108, %111 : vector<15x16x128xf32>
    %c0_57 = arith.constant 0 : index
    %c0_58 = arith.constant 0 : index
    %c1_59 = arith.constant 1 : index
    %c0_60 = arith.constant 0 : index
    %c128_61 = arith.constant 128 : index
    %113 = vector.load %arg5[%c0_57, %c0_58, %c1_59, %c0_60, %c128_61] : memref<1x16x2x16x256xf32, #tpu.memory_space<vmem>>, vector<1x15x1x16x128xf32>
    %114 = vector.shape_cast %113 : vector<1x15x1x16x128xf32> to vector<15x16x128xf32>
    %115 = vector.shape_cast %112 : vector<15x16x128xf32> to vector<1x15x1x16x128xf32>
    tpu.vector_store %arg5[%c0_57, %c0_58, %c1_59, %c0_60, %c128_61], %115 {strides = array<i32>} : memref<1x16x2x16x256xf32, #tpu.memory_space<vmem>>, vector<1x15x1x16x128xf32>,
    %116 = vector.extract_strided_slice %16 {offsets = [15, 0, 0], sizes = [1, 16, 128], strides = [1, 1, 1]} : vector<16x16x128xf32> to vector<1x16x128xf32>
    %117 = vector.shape_cast %116 : vector<1x16x128xf32> to vector<16x128xf32>
    %cst_62 = arith.constant 7.500000e-01 : f32
    %118 = vector.broadcast %cst_62 : f32 to vector<16x128xf32>
    %119 = arith.mulf %118, %117 : vector<16x128xf32>
    %120 = vector.shape_cast %48 : vector<1x16x128xf32> to vector<16x128xf32>
    %cst_63 = arith.constant 2.500000e-01 : f32
    %121 = vector.broadcast %cst_63 : f32 to vector<16x128xf32>
    %122 = arith.mulf %121, %120 : vector<16x128xf32>
    %123 = arith.addf %119, %122 : vector<16x128xf32>
    %c0_64 = arith.constant 0 : index
    %c15 = arith.constant 15 : index
    %c1_65 = arith.constant 1 : index
    %c0_66 = arith.constant 0 : index
    %c0_67 = arith.constant 0 : index
    %124 = vector.load %arg5[%c0_64, %c15, %c1_65, %c0_66, %c0_67] : memref<1x16x2x16x256xf32, #tpu.memory_space<vmem>>, vector<1x1x1x16x128xf32>
    %125 = vector.shape_cast %124 : vector<1x1x1x16x128xf32> to vector<16x128xf32>
    %126 = vector.shape_cast %123 : vector<16x128xf32> to vector<1x1x1x16x128xf32>
    tpu.vector_store %arg5[%c0_64, %c15, %c1_65, %c0_66, %c0_67], %126 {strides = array<i32>} : memref<1x16x2x16x256xf32, #tpu.memory_space<vmem>>, vector<1x1x1x16x128xf32>,
    %127 = vector.extract_strided_slice %21 {offsets = [15, 0, 0], sizes = [1, 16, 128], strides = [1, 1, 1]} : vector<16x16x128xf32> to vector<1x16x128xf32>
    %128 = vector.shape_cast %127 : vector<1x16x128xf32> to vector<16x128xf32>
    %cst_68 = arith.constant 7.500000e-01 : f32
    %129 = vector.broadcast %cst_68 : f32 to vector<16x128xf32>
    %130 = arith.mulf %129, %128 : vector<16x128xf32>
    %131 = vector.shape_cast %53 : vector<1x16x128xf32> to vector<16x128xf32>
    %cst_69 = arith.constant 2.500000e-01 : f32
    %132 = vector.broadcast %cst_69 : f32 to vector<16x128xf32>
    %133 = arith.mulf %132, %131 : vector<16x128xf32>
    %134 = arith.addf %130, %133 : vector<16x128xf32>
    %c0_70 = arith.constant 0 : index
    %c15_71 = arith.constant 15 : index
    %c1_72 = arith.constant 1 : index
    %c0_73 = arith.constant 0 : index
    %c128_74 = arith.constant 128 : index
    %135 = vector.load %arg5[%c0_70, %c15_71, %c1_72, %c0_73, %c128_74] : memref<1x16x2x16x256xf32, #tpu.memory_space<vmem>>, vector<1x1x1x16x128xf32>
    %136 = vector.shape_cast %135 : vector<1x1x1x16x128xf32> to vector<16x128xf32>
    %137 = vector.shape_cast %134 : vector<16x128xf32> to vector<1x1x1x16x128xf32>
    tpu.vector_store %arg5[%c0_70, %c15_71, %c1_72, %c0_73, %c128_74], %137 {strides = array<i32>} : memref<1x16x2x16x256xf32, #tpu.memory_space<vmem>>, vector<1x1x1x16x128xf32>,
    return
  }
  func.func @transform_0(%arg0: i32, %arg1: i32) -> (i32, i32, i32, i32) {
    %c0_i32 = arith.constant 0 : i32
    %c0_i32_0 = arith.constant 0 : i32
    %c0_i32_1 = arith.constant 0 : i32
    return %arg0, %arg1, %c0_i32, %c0_i32_0 : i32, i32, i32, i32
  }
  func.func @transform_1(%arg0: i32, %arg1: i32) -> (i32, i32, i32, i32) {
    %c16_i32 = arith.constant 16 : i32
    %0 = arith.muli %arg1, %c16_i32 : i32
    %c1_i32 = arith.constant 1 : i32
    %1 = arith.subi %0, %c1_i32 : i32
    %c0_i32 = arith.constant 0 : i32
    %2 = arith.maxsi %1, %c0_i32 : i32
    %c0_i32_0 = arith.constant 0 : i32
    %c0_i32_1 = arith.constant 0 : i32
    %c0_i32_2 = arith.constant 0 : i32
    return %arg0, %2, %c0_i32_0, %c0_i32_1 : i32, i32, i32, i32
  }
  func.func @transform_2(%arg0: i32, %arg1: i32) -> (i32, i32, i32, i32) {
    %c16_i32 = arith.constant 16 : i32
    %0 = arith.muli %arg1, %c16_i32 : i32
    %c16_i32_0 = arith.constant 16 : i32
    %1 = arith.addi %0, %c16_i32_0 : i32
    %c15_i32 = arith.constant 15 : i32
    %2 = arith.minsi %1, %c15_i32 : i32
    %c0_i32 = arith.constant 0 : i32
    %c0_i32_1 = arith.constant 0 : i32
    %c0_i32_2 = arith.constant 0 : i32
    return %arg0, %2, %c0_i32, %c0_i32_1 : i32, i32, i32, i32
  }
  func.func @transform_3(%arg0: i32, %arg1: i32) -> (i32, i32, i32, i32, i32) {
    %c0_i32 = arith.constant 0 : i32
    %c0_i32_0 = arith.constant 0 : i32
    %c0_i32_1 = arith.constant 0 : i32
    %c0_i32_2 = arith.constant 0 : i32
    return %arg0, %arg1, %c0_i32, %c0_i32_0, %c0_i32_1 : i32, i32, i32, i32, i32
  }
}

</mosaic_0001>

<bundles_post_ra>
// kernel: tpu_custom_call.1
= control target key start
LH: loop header
LB: loop body
LE: loop exit
PB: predicated region body
PF: predicated region fallthrough
CT: control target
= control target key end

     0   :  { %6 = vsyncpa [#allocation3], 0  ;;  %s133_s0 = inlined_call_operand.hbm [shape: f32[2,16,128], index: 0, kind: input, shape index: {}]   ;;  %s134_s1 = inlined_call_operand.hbm [shape: f32[2,16,128], index: 1, kind: output, shape index: {}]  }
   0x1   :  { %7 = vsyncpa [#allocation4], 0  ;;  %s107_s6 = smov [#allocation2]  }
   0x2   :  { %s13_s7 = sshll.u32 %s107_s6, 4  ;;  %s14_s7 = int_to_ptr.vmem [resolvable:$true] %s13_s7 }
   0x3   :  { %s71_s8 = scalar_lea.vmem %s14_s7, 512  ;;  %p76_p1 = scmp.lt.s32.totalorder %s14_s7, %s14_s7 }
   0x4   :  { %p72_p0 = scmp.ne.s32.totalorder %s14_s7, %s71_s8  ;;  %p77_p2 = scmp.lt.s32.totalorder %s71_s8, %s71_s8 }
   0x6   :  { %p78_p3 = por %p77_p2, %p76_p1 }
   0x8   :  { %p79_p4 = pnand %p78_p3, %p72_p0 }
   0xa   :  { %82 = shalt.err (!%p79_p4)
}
   0xb   :  { %s108_s9 = smov 128   ;;  %s109_s10 = smov 8  }
   0xc   :  { %19 = dma.hbm_to_vmem [thread:$0]  %s133_s0, 512, %s14_s7, [#allocation3], %s108_s9, %s108_s9, %s109_s10  }
   0xd   :  { %103 = dma.done.wait [#allocation3], 512  }
   0xe   :  { %104 = vsyncadd [#allocation3], 4294966784  ;;  %v31_v0 = vlaneseq  ;;  %v23_v2 = vld [vmem:[#allocation2] sm:$0xff]  ;;  %v24_v3 = vld [vmem:[#allocation2 + $0x8] sm:$0xff]  ;;  %s110_s13 = smov [#allocation5]  }
   0xf   :  { %v25_v4 = vld [vmem:[#allocation2 + $0x10] sm:$0xff]  ;;  %s47_s14 = sshll.u32 %s110_s13, 4  ;;  %v27_v5 = vrot.slane %v23_v2, 7  ;;  %v29_v6 = vrot.slane %v24_v3, 7  ;;  %v26_v7 = vld [vmem:[#allocation2 + $0x18] sm:$0xff]  ;;  %s48_s14 = int_to_ptr.vmem [resolvable:$true] %s47_s14 }
  0x10   :  { %v32_v1 = vshrl.u32 %v31_v0, 7  ;;  %v28_v8 = vrot.slane %v25_v4, 7  ;;  %v30_v9 = vrot.slane %v26_v7, 7  ;;  %s83_s0 = scalar_lea.vmem %s48_s14, 512  ;;  %p88_p6 = scmp.lt.s32.totalorder %s48_s14, %s48_s14 }
  0x11   :  { %p84_p5 = scmp.ne.s32.totalorder %s48_s14, %s83_s0  ;;  %p89_p7 = scmp.lt.s32.totalorder %s83_s0, %s83_s0 }
  0x12   :  { %vm33_vm0 = vcmp.lt.s32.totalorder %v32_v1, 1 }
  0x13   :  { %v36_v10 = vsel %vm33_vm0, %v29_v6, %v27_v5  ;;  %v34_v11 = vsel %vm33_vm0, %v27_v5, %v29_v6  ;;  %v37_v12 = vsel %vm33_vm0, %v30_v9, %v28_v8  ;;  %v35_v13 = vsel %vm33_vm0, %v28_v8, %v30_v9  ;;  %p90_p8 = por %p89_p7, %p88_p6 }
  0x14   :  { %38 = vst [vmem:[#allocation5] sm:$0xff] %v36_v10  ;;  %39 = vst [vmem:[#allocation5 + $0x8] sm:$0xff] %v34_v11 }
  0x15   :  { %40 = vst [vmem:[#allocation5 + $0x10] sm:$0xff] %v37_v12  ;;  %41 = vst [vmem:[#allocation5 + $0x18] sm:$0xff] %v35_v13  ;;  %p91_p9 = pnand %p90_p8, %p84_p5 }
  0x17   :  { %94 = shalt.err (!%p91_p9)
}
  0x18   :  { %53 = dma.vmem_to_hbm [thread:$0]  %s48_s14, 512, %s134_s1, [#allocation4], %s108_s9, %s108_s9, %s109_s10  }
  0x19   :  { %105 = dma.done.wait [#allocation4], 512  }
  0x1a   :  { %106 = vsyncadd [#allocation4], 4294966784 }
  0x1b   :  { %57 = vsyncpa [#allocation3], 1 }
  0x1c   :  { %58 = vsyncpa [#allocation4], 1 }

// kernel: tpu_custom_call.1
= control target key start
LH: loop header
LB: loop body
LE: loop exit
PB: predicated region body
PF: predicated region fallthrough
CT: control target
= control target key end

     0   :  { %s3030_s0 = inlined_call_operand.hbm [shape: f32[2,16,16,128], index: 0, kind: input, shape index: {}]   ;;  %s3031_s1 = inlined_call_operand.hbm [shape: f32[2,16,16,128], index: 1, kind: input, shape index: {}]   ;;  %s3032_s2 = inlined_call_operand.hbm [shape: f32[2,16,16,128], index: 2, kind: input, shape index: {}]   ;;  %s3033_s3 = inlined_call_operand.hbm [shape: f32[2,16,2,16,256], index: 3, kind: output, shape index: {}]  }
   0x1   :  { %3142 = sst [smem:[#allocation98_spill]] %s3031_s1 }
   0x2   :  { %8 = vsyncpa [#allocation3], 0 }
   0x3   :  { %10 = vsyncpa [#allocation3 + $0x1], 0 }
   0x4   :  { %11 = vsyncpa [#allocation6], 0 }
   0x5   :  { %13 = vsyncpa [#allocation6 + $0x1], 0 }
   0x6   :  { %14 = vsyncpa [#allocation4], 0 }
   0x7   :  { %16 = vsyncpa [#allocation4 + $0x1], 0  ;;  %s1772_s12 = smov 0   ;;  %s1774_s13 = smov 0  }
   0x8   :  { %s1776_s14 = smov 0   ;;  %s1778_s15 = smov 0  }
   0x9   :  { %s1780_s16 = smov 0   ;;  %s1782_s17 = smov 0  }
   0xa LB: > { %3143 = sst [smem:[#allocation12_spill]] %s1730_s14  ;;  %s1803_s18 = sadd.s32 4294967295, %s1742_s17   ;;  %s1742_s17 = sphi %s1782_s17, %s22_s17   ;;  %s1738_s16 = sphi %s1780_s16, %s3356_s16   ;;  %s1734_s15 = sphi %s1778_s15, %s3355_s15   ;;  %s1730_s14 = sphi %s1776_s14, %s3354_s14   ;;  %s1726_s13 = sphi %s1774_s13, %s3358_s13   ;;  %s1722_s12 = sphi %s1772_s12, %s3357_s12  }
   0xb   : > { %3144 = sst [smem:[#allocation13_spill]] %s1738_s16  ;;  %s1346_s19 = sadd.s32 4294967294, %s1742_s17  }
   0xc   : > { %s34_s20 = sadd.s32 1, %s1738_s16  ;;  %s43_s21 = sadd.s32 1, %s1730_s14 }
   0xd   : > { %p36_p0 = scmp.ge.s32.totalorder %s34_s20, 2  ;;  %p50_p1 = scmp.ne.s32.totalorder %s1730_s14, %s1726_s13 }
   0xe   : > { %p51_p2 = scmp.eq.s32.totalorder %s1742_s17, 0  ;;  %p56_p3 = scmp.ne.s32.totalorder %s1726_s13, %s1722_s12 }
   0xf   : > { %s3360_s20 = smov (%p36_p0, %s34_s20), 0  ;;  %p57_p5 = scmp.eq.s32.totalorder %s1803_s18, 0 }
  0x10   : > { %3145 = sst [smem:[#allocation14_spill]] %s3360_s20  ;;  %p1815_p4 = por %p51_p2, %p50_p1 }
  0x11   : > { %s38_s23 = ssub.s32 %s1738_s16, %s3360_s20  ;;  %p154_p6 = scmp.eq.s32.totalorder %s1803_s18, 1 }
  0x12   : > { %p41_p7 = scmp.eq.s32.totalorder %s38_s23, 0  ;;  %p1823_p8 = por %p57_p5, %p56_p3 }
  0x13   : > { %p1827_p9 = por %p154_p6, %p50_p1  ;;  %p160_p10 = scmp.eq.s32.totalorder %s1346_s19, 1 }
  0x14   : > { %s1832_s26 = scalar_select %p41_p7, %s1730_s14, %s43_s21  }
  0x15   : > { %p1834_p11 = por %p160_p10, %p56_p3  ;;  %p1520_p13 = scmp.lt.s32.totalorder %s1742_s17, 2 }
  0x16   : > { %3149 = sst [smem:[#allocation15_spill]] %s1832_s26  ;;  %s1841_s28 = sand.u32 1, %s1730_s14  }
  0x17   : > { %s1844_s29 = sshll.u32 %s1738_s16, 12  ;;  %p1848_p0 = pnand %p1520_p13, %p1815_p4 }
  0x18   : > { %s204_s4 = sand.u32 1, %s1742_s17   ;;  %s1352_s5 = sshll.u32 %s1841_s28, 4 }
  0x19   : > { %s3152_s1 = sld [smem:[#allocation98_spill]]  ;;  %s208_s9 = scalar_lea.vmem [#allocation5], %s1352_s5 }
  0x1a   : > { %s221_s10 = sshll.u32 %s208_s9, 4  ;;  %s235_s11 = scalar_lea.vmem [#allocation7], %s1352_s5  ;;  %s222_s10 = int_to_ptr.vmem [resolvable:$true] %s221_s10 }
  0x1b   : > { %s248_s19 = sshll.u32 %s235_s11, 4  ;;  %s1858_s21 = scalar_lea.sflag [#allocation6], %s204_s4  ;;  %s1871_s19 = int_to_ptr.vmem [resolvable:$true] %s248_s19 }
  0x1c   : > { %p1576_p1 = pneg %p1848_p0  ;;  %s1587_s22 = scalar_lea.vmem %s222_s10, 256 }
  0x1d   : > { %p1588_p2 = scmp.ne.s32.totalorder %s222_s10, %s1587_s22  ;;  %s1744_s23 = smov [#allocation5]  }
  0x1e   : > { %s1592_s20 = sshll.u32 %s1744_s23, 4  ;;  %s1593_s20 = int_to_ptr.vmem [resolvable:$false] %s1592_s20 }
  0x1f   : > { %s220_s8 = scalar_lea.hbm %s3152_s1, %s1844_s29  ;;  %p1590_p3 = pnand %p1588_p2, %p1576_p1 }
  0x20   : > { %s1594_s6 = scalar_lea.vmem %s1593_s20, 512  ;;  %p1595_p5 = scmp.lt.s32.totalorder %s222_s10, %s1593_s20 }
  0x21   : > { %p1591_p4 = pneg %p1590_p3  ;;  %p1596_p6 = scmp.lt.s32.totalorder %s1594_s6, %s1587_s22 }
  0x23   : > { %p1597_p7 = por %p1596_p6, %p1595_p5 }
  0x25   : > { %p1598_p10 = pnand %p1597_p7, %p1591_p4 }
  0x27   : > { %1601 = shalt.err (!%p1598_p10)
}
  0x28   : > { %s3036_s5 = smov 128   ;;  %s3038_s4 = smov 8  }
  0x29   : > { %1512 = dma.hbm_to_vmem [thread:$0]  (!%p1848_p0), %s220_s8, 256, %s222_s10, %s1858_s21, %s3036_s5, %s3036_s5, %s3038_s4  }
  0x2a   : > { %p1358_p13 = scmp.ge.s32.totalorder %s1742_s17, 1  ;;  %p256_p2 = scmp.lt.s32.totalorder %s1742_s17, 3 }
  0x2b   : > { %s1349_s7 = sshll.u32 %s1841_s28, 8  ;;  %s193_s22 = scalar_lea.hbm %s3030_s0, %s1844_s29 }
  0x2c   : > { %p1875_p3 = pnand %p1358_p13, %p256_p2  ;;  %s184_s23 = scalar_lea.vmem [#allocation2], %s1349_s7 }
  0x2d   : > { %s194_s6 = sshll.u32 %s184_s23, 4  ;;  %s1495_s1 = sadd.s32 3840, %s1844_s29  ;;  %s195_s6 = int_to_ptr.vmem [resolvable:$true] %s194_s6 }
  0x2e   : > { %s1888_s8 = scalar_lea.hbm %s3032_s2, %s1495_s1  ;;  %s181_s10 = scalar_lea.sflag [#allocation3], %s1841_s28 }
  0x2f   : > { %s1615_s5 = scalar_lea.vmem %s195_s6, 4096  ;;  %s1747_s4 = smov [#allocation2]  }
  0x30   : > { %p1616_p4 = scmp.ne.s32.totalorder %s195_s6, %s1615_s5  ;;  %s1620_s14 = sshll.u32 %s1747_s4, 4  ;;  %s1621_s14 = int_to_ptr.vmem [resolvable:$false] %s1620_s14 }
  0x31   : > { %s1622_s9 = scalar_lea.vmem %s1621_s14, 8192  ;;  %p1623_p7 = scmp.lt.s32.totalorder %s195_s6, %s1621_s14 }
  0x32   : > { %p1618_p5 = pnand %p1616_p4, %p1576_p1  ;;  %p1624_p10 = scmp.lt.s32.totalorder %s1622_s9, %s1615_s5 }
  0x34   : > { %p1619_p6 = pneg %p1618_p5  ;;  %p1625_p13 = por %p1624_p10, %p1623_p7 }
  0x36   : > { %p1626_p2 = pnand %p1625_p13, %p1619_p6 }
  0x38   : > { %1629 = shalt.err (!%p1626_p2)
}
  0x39   : > { %s3154_s1 = smov 8   ;;  %s3155_s16 = smov 128  }
  0x3a   : > { %1509 = dma.hbm_to_vmem [thread:$0]  (!%p1848_p0), %s193_s22, 4096, %s195_s6, %s181_s10, %s3155_s16, %s3155_s16, %s3154_s1  }
  0x3b   : > { %s1643_s26 = scalar_lea.vmem %s1871_s19, 256  ;;  %s1748_s14 = smov [#allocation7]  }
  0x3c   : > { %p1644_p4 = scmp.ne.s32.totalorder %s1871_s19, %s1643_s26  ;;  %s1648_s28 = sshll.u32 %s1748_s14, 4  ;;  %s1649_s28 = int_to_ptr.vmem [resolvable:$false] %s1648_s28 }
  0x3d   : > { %s1650_s29 = scalar_lea.vmem %s1649_s28, 512  ;;  %p1651_p6 = scmp.lt.s32.totalorder %s1871_s19, %s1649_s28 }
  0x3e   : > { %p1646_p5 = pnand %p1644_p4, %p1576_p1  ;;  %p1652_p7 = scmp.lt.s32.totalorder %s1650_s29, %s1643_s26 }
  0x40   : > { %p1647_p12 = pneg %p1646_p5  ;;  %p1653_p10 = por %p1652_p7, %p1651_p6 }
  0x42   : > { %p1654_p13 = pnand %p1653_p10, %p1647_p12 }
  0x44   : > { %1657 = shalt.err (!%p1654_p13)
}
  0x45   : > { %1515 = dma.hbm_to_vmem [thread:$0]  (!%p1848_p0), %s1888_s8, 256, %s1871_s19, %s1858_s21, %s3155_s16, %s3155_s16, %s3154_s1  }
  0x46   : > { %260 = sbr.rel (%p1875_p3) target bundleno = 261 (0x105), region = 32 }
  0x4b   : > { %s1916_s5 = sand.u32 1, %s1726_s13  }
  0x4c   : > { %s1359_s4 = sshll.u32 %s1916_s5, 8  ;;  %s263_s7 = scalar_lea.sflag [#allocation3], %s1916_s5 }
  0x4d   : > { %s1920_s11 = scalar_lea.vmem [#allocation2], %s1359_s4 }
  0x4e   : > { %1709 = dma.done.wait (%p1823_p8), %s263_s7, 4096  }
  0x4f   : > { %1711 = vsyncadd (%p1823_p8), %s263_s7, 4294963200  ;;  %s271_s30 = sand.u32 1, %s1803_s18   ;;  %s1360_s19 = sshll.u32 %s1916_s5, 4 }
  0x50   : > { %s272_s21 = scalar_lea.sflag [#allocation6], %s271_s30  ;;  %s275_s20 = scalar_lea.vmem [#allocation5], %s1360_s19 }
  0x51   : > { %1713 = dma.done.wait (%p1823_p8), %s272_s21, 512  }
  0x52   : > { %1715 = vsyncadd (%p1823_p8), %s272_s21, 4294966784  ;;  %v327_v0 = vld [vmem:[%s1920_s11] sm:$0xff]  ;;  %vm395_vm0 = vcmask 1040384   ;;  %v328_v2 = vld [vmem:[%s1920_s11 + $0x8] sm:$0xff]  ;;  %vm492_vm1 = vcmask 1046528   ;;  %s1362_s18 = sshll.u32 %s1916_s5, 10 }
  0x53   : > { %v359_v1 = vld [vmem:[%s275_s20] sm:$0xff]  ;;  %v396_v3 = vrot.slane %v327_v0, 7  ;;  %v621_v4 = vmul.f32 0.75, %v327_v0  ;;  %v360_v7 = vld [vmem:[%s275_s20 + $0x8] sm:$0xff]  ;;  %v397_v8 = vrot.slane %v328_v2, 7  ;;  %v622_v9 = vmul.f32 0.75, %v328_v2 }
  0x54   : > { %v751_v5 = vrot.slane %v359_v1, 7  ;;  %v765_v6 = vmul.f32 0.75, %v359_v1  ;;  %v752_v10 = vrot.slane %v360_v7, 7  ;;  %v766_v11 = vmul.f32 0.75, %v360_v7  ;;  %v1941_v20 = vld [vmem:[%s1920_s11 + $0x10] sm:$0xff]  ;;  %v1955_v41 = vld [vmem:[%s1920_s11 + $0x18] sm:$0xff] }
  0x55   : > { %v476_v12 = vsel %vm395_vm0, %v327_v0, %v396_v3  ;;  %v493_v14 = vrot.slane %v327_v0, 1  ;;  %v494_v15 = vrot.slane %v328_v2, 1  ;;  %v398_v18 = vsel %vm395_vm0, %v396_v3, %v397_v8  ;;  %v1968_v50 = vld [vmem:[%s1920_s11 + $0x20] sm:$0xff]  ;;  %s1970_s24 = scalar_lea.vmem [#allocation8], %s1362_s18  ;;  %v1985_v59 = vld [vmem:[%s1920_s11 + $0x28] sm:$0xff]  ;;  %s284_s22 = scalar_lea.vmem [#allocation7], %s1360_s19 }
  0x56   : > { %v756_v13 = vsel %vm395_vm0, %v359_v1, %v751_v5  ;;  %v589_v16 = vmul.f32 0.25, %v476_v12  ;;  %v753_v19 = vsel %vm395_vm0, %v751_v5, %v752_v10  ;;  %v590_v21 = vmul.f32 0.25, %v398_v18  ;;  %s1496_s23 = sshll.u32 %s1734_s15, 14  ;;  %s1209_s6 = sshll.u32 %s1970_s24, 4  ;;  %s2976_s6 = int_to_ptr.vmem [resolvable:$true] %s1209_s6 }
  0x57   : > { %v763_v17 = vmul.f32 0.25, %v756_v13  ;;  %v764_v22 = vmul.f32 0.25, %v753_v19  ;;  %v495_v23 = vsel %vm492_vm1, %v493_v14, %v494_v15  ;;  %v757_v24 = vrot.slane %v359_v1, 1  ;;  %v2011_v13 = vld [vmem:[%s1920_s11 + $0x38] sm:$0xff]  ;;  %v2014_v14 = vld [vmem:[%s1920_s11 + $0x40] sm:$0xff]  ;;  %s2974_s9 = scalar_lea.hbm %s3033_s3, %s1496_s23  ;;  %s1193_s15 = scalar_lea.sflag [#allocation4], %s1916_s5 }
  0x58   : > { %v653_v25 = vadd.f32 %v621_v4, %v589_v16  ;;  %v685_v27 = vmul.f32 0.25, %v495_v23  ;;  %v758_v28 = vrot.slane %v360_v7, 1  ;;  %v654_v29 = vadd.f32 %v622_v9, %v590_v21  ;;  %s1658_s1 = scalar_lea.vmem %s2976_s6, 16384  ;;  %s1749_s16 = smov [#allocation8]  }
  0x59   : > { %v767_v26 = vadd.f32 %v765_v6, %v763_v17  ;;  %v768_v30 = vadd.f32 %v766_v11, %v764_v22  ;;  %v573_v31 = vsel %vm492_vm1, %v494_v15, %v328_v2  ;;  %v399_v32 = vrot.slane %v1941_v20, 7  ;;  %p1659_p8 = scmp.ne.s32.totalorder %s2976_s6, %s1658_s1  ;;  %s1662_s26 = sshll.u32 %s1749_s16, 4  ;;  %s1663_s26 = int_to_ptr.vmem [resolvable:$false] %s1662_s26 }
  0x5a   : > { %v1947_v34 = vmul.f32 0.75, %v653_v25  ;;  %v1949_v35 = vadd.f32 %v685_v27, %v621_v4  ;;  %v759_v36 = vsel %vm492_vm1, %v757_v24, %v758_v28  ;;  %v1952_v38 = vmul.f32 0.75, %v654_v29  ;;  %v1995_v4 = vld [vmem:[%s1920_s11 + $0x30] sm:$0xff]  ;;  %s1664_s14 = scalar_lea.vmem %s1663_s26, 32768  ;;  %p1665_p1 = scmp.lt.s32.totalorder %s2976_s6, %s1663_s26 }
  0x5b   : > { %v797_v33 = vmul.f32 0.25, %v767_v26  ;;  %v798_v37 = vmul.f32 0.25, %v768_v30  ;;  %v769_v39 = vmul.f32 0.25, %v759_v36  ;;  %v686_v40 = vmul.f32 0.25, %v573_v31  ;;  %p1660_p12 = pnand %p1659_p8, %p1827_p9  ;;  %p1666_p3 = scmp.lt.s32.totalorder %s1664_s14, %s1658_s1 }
  0x5c   : > { %3156 = vst [vmem:[#allocation16_spill] sm:$0xff] %v1947_v34  ;;  %3157 = vst [vmem:[#allocation17_spill] sm:$0xff] %v1952_v38  ;;  %v1959_v43 = vmul.f32 0.75, %v1949_v35  ;;  %v762_v44 = vsel %vm492_vm1, %v758_v28, %v360_v7  ;;  %v477_v45 = vsel %vm395_vm0, %v1941_v20, %v399_v32  ;;  %v1974_v52 = vmul.f32 0.75, %v1941_v20 }
  0x5d   : > { %v801_v42 = vadd.f32 %v1947_v34, %v797_v33  ;;  %v802_v46 = vadd.f32 %v1952_v38, %v798_v37  ;;  %v771_v47 = vadd.f32 %v769_v39, %v765_v6  ;;  %v1965_v48 = vadd.f32 %v686_v40, %v622_v9  ;;  %v2289_v38 = vld [vmem:[%s1920_s11 + $0xc0] sm:$0xff]  ;;  %v2309_v34 = vld [vmem:[%s1920_s11 + $0xd0] sm:$0xff]  ;;  %p1661_p0 = pneg %p1660_p12  ;;  %p1667_p2 = por %p1666_p3, %p1665_p1 }
  0x5e   : > { %3158 = vst [vmem:[#allocation18_spill] sm:$0xff] %v1959_v43  ;;  %v770_v49 = vmul.f32 0.25, %v762_v44  ;;  %v591_v51 = vmul.f32 0.25, %v477_v45  ;;  %v813_v53 = vmul.f32 0.25, %v653_v25  ;;  %v400_v54 = vrot.slane %v1955_v41, 7  ;;  %3200 = vst [vmem:[#allocation60_spill] sm:$0xff] %v2289_v38 }
  0x5f   : > { %803 = vst [vmem:[%s1970_s24] sm:$0xff] %v801_v42  ;;  %804 = vst [vmem:[%s1970_s24 + $0x10] sm:$0xff] %v802_v46  ;;  %v805_v55 = vmul.f32 0.25, %v771_v47  ;;  %v1979_v57 = vmul.f32 0.75, %v1965_v48  ;;  %v1982_v58 = vmul.f32 0.75, %v1955_v41  ;;  %v814_v62 = vmul.f32 0.25, %v654_v29  ;;  %v2058_v46 = vld [vmem:[%s1920_s11 + $0x50] sm:$0xff]  ;;  %p1668_p4 = pnand %p1667_p2, %p1661_p0 }
  0x60   : > { %v772_v56 = vadd.f32 %v770_v49, %v766_v11  ;;  %v655_v60 = vadd.f32 %v1974_v52, %v591_v51  ;;  %v401_v61 = vsel %vm395_vm0, %v399_v32, %v400_v54  ;;  %v402_v63 = vrot.slane %v1968_v50, 7  ;;  %v2041_v32 = vld [vmem:[%s1920_s11 + $0x48] sm:$0xff]  ;;  %3205 = vst [vmem:[#allocation65_spill] sm:$0xff] %v2309_v34 }
  0x61   : > { %3159 = vst [vmem:[#allocation19_spill] sm:$0xff] %v1979_v57  ;;  %v809_v0 = vadd.f32 %v1959_v43, %v805_v55  ;;  %v592_v2 = vmul.f32 0.25, %v401_v61  ;;  %v1992_v3 = vmul.f32 0.75, %v1968_v50  ;;  %v403_v8 = vrot.slane %v1985_v59, 7  ;;  %v2075_v61 = vld [vmem:[%s1920_s11 + $0x58] sm:$0xff] }
  0x62   : > { %v806_v1 = vmul.f32 0.25, %v772_v56  ;;  %v1997_v5 = vmul.f32 0.75, %v655_v60  ;;  %v478_v6 = vsel %vm395_vm0, %v1968_v50, %v402_v63  ;;  %v2001_v7 = vmul.f32 0.25, %v655_v60 }
  0x63   : > { %811 = vst [vmem:[%s1970_s24 + $0x8] sm:$0xff] %v809_v0  ;;  %v656_v10 = vadd.f32 %v1982_v58, %v592_v2  ;;  %v593_v11 = vmul.f32 0.25, %v478_v6  ;;  %v2008_v12 = vmul.f32 0.75, %v1985_v59  ;;  %v404_v16 = vsel %vm395_vm0, %v402_v63, %v403_v8 }
  0x64   : > { %3160 = vst [vmem:[#allocation20_spill] sm:$0xff] %v1997_v5  ;;  %3161 = vst [vmem:[#allocation21_spill] sm:$0xff] %v2001_v7  ;;  %v810_v9 = vadd.f32 %v1979_v57, %v806_v1  ;;  %v873_v15 = vadd.f32 %v1997_v5, %v813_v53  ;;  %v405_v17 = vrot.slane %v1995_v4, 7  ;;  %v2020_v18 = vmul.f32 0.75, %v1995_v4 }
  0x65   : > { %v2023_v19 = vmul.f32 0.75, %v656_v10  ;;  %v657_v21 = vadd.f32 %v1992_v3, %v593_v11  ;;  %v594_v22 = vmul.f32 0.25, %v404_v16  ;;  %v2026_v23 = vmul.f32 0.25, %v656_v10  ;;  %v2091_v10 = vld [vmem:[%s1920_s11 + $0x60] sm:$0xff] }
  0x66   : > { %812 = vst [vmem:[%s1970_s24 + $0x18] sm:$0xff] %v810_v9  ;;  %1363 = vst [vmem:[%s1970_s24 + $0x40] sm:$0xff] %v873_v15  ;;  %v479_v24 = vsel %vm395_vm0, %v1995_v4, %v405_v17  ;;  %v406_v25 = vrot.slane %v2011_v13, 7  ;;  %v2033_v26 = vmul.f32 0.75, %v2011_v13  ;;  %v408_v27 = vrot.slane %v2014_v14, 7 }
  0x67   : > { %3162 = vst [vmem:[#allocation22_spill] sm:$0xff] %v2023_v19  ;;  %3163 = vst [vmem:[#allocation23_spill] sm:$0xff] %v2026_v23  ;;  %v874_v28 = vadd.f32 %v2023_v19, %v814_v62  ;;  %v2037_v29 = vmul.f32 0.75, %v657_v21  ;;  %v658_v30 = vadd.f32 %v2008_v12, %v594_v22  ;;  %v595_v31 = vmul.f32 0.25, %v479_v24 }
  0x68   : > { %v2043_v33 = vmul.f32 0.25, %v657_v21  ;;  %v407_v36 = vsel %vm395_vm0, %v405_v17, %v406_v25  ;;  %v480_v37 = vsel %vm395_vm0, %v2014_v14, %v408_v27  ;;  %v2049_v39 = vmul.f32 0.75, %v2014_v14 }
  0x69   : > { %3164 = vst [vmem:[#allocation24_spill] sm:$0xff] %v2037_v29  ;;  %1364 = vst [vmem:[%s1970_s24 + $0x50] sm:$0xff] %v874_v28  ;;  %v875_v40 = vadd.f32 %v2037_v29, %v2001_v7  ;;  %v2054_v42 = vmul.f32 0.75, %v658_v30  ;;  %v659_v44 = vadd.f32 %v2020_v18, %v595_v31  ;;  %v596_v45 = vmul.f32 0.25, %v407_v36  ;;  %v2111_v28 = vld [vmem:[%s1920_s11 + $0x70] sm:$0xff]  ;;  %v2306_v7 = vld [vmem:[%s1920_s11 + $0xc8] sm:$0xff] }
  0x6a   : > { %3165 = vst [vmem:[#allocation25_spill] sm:$0xff] %v2043_v33  ;;  %v2060_v47 = vmul.f32 0.25, %v658_v30  ;;  %v597_v49 = vmul.f32 0.25, %v480_v37  ;;  %v409_v51 = vrot.slane %v2041_v32, 7  ;;  %v2064_v53 = vmul.f32 0.75, %v2041_v32  ;;  %3204 = vst [vmem:[#allocation64_spill] sm:$0xff] %v2306_v7 }
  0x6b   : > { %3166 = vst [vmem:[#allocation26_spill] sm:$0xff] %v2054_v42  ;;  %1365 = vst [vmem:[%s1970_s24 + $0x80] sm:$0xff] %v875_v40  ;;  %v876_v54 = vadd.f32 %v2054_v42, %v2026_v23  ;;  %v2069_v55 = vmul.f32 0.75, %v659_v44  ;;  %v660_v56 = vadd.f32 %v2033_v26, %v596_v45  ;;  %v2072_v60 = vmul.f32 0.25, %v659_v44 }
  0x6c   : > { %3167 = vst [vmem:[#allocation27_spill] sm:$0xff] %v2060_v47  ;;  %v661_v62 = vadd.f32 %v2049_v39, %v597_v49  ;;  %v410_v63 = vsel %vm395_vm0, %v408_v27, %v409_v51  ;;  %v411_v0 = vrot.slane %v2058_v46, 7  ;;  %v2081_v1 = vmul.f32 0.75, %v2058_v46  ;;  %v2108_v27 = vld [vmem:[%s1920_s11 + $0x68] sm:$0xff] }
  0x6d   : > { %3168 = vst [vmem:[#allocation28_spill] sm:$0xff] %v2069_v55  ;;  %3169 = vst [vmem:[#allocation29_spill] sm:$0xff] %v2072_v60  ;;  %v877_v2 = vadd.f32 %v2069_v55, %v2043_v33  ;;  %v2086_v6 = vmul.f32 0.75, %v660_v56  ;;  %v598_v8 = vmul.f32 0.25, %v410_v63  ;;  %v2088_v9 = vmul.f32 0.25, %v660_v56  ;;  %v2207_v55 = vld [vmem:[%s1920_s11 + $0x98] sm:$0xff] }
  0x6e   : > { %1366 = vst [vmem:[%s1970_s24 + $0x90] sm:$0xff] %v876_v54  ;;  %v2093_v11 = vmul.f32 0.75, %v661_v62  ;;  %v481_v15 = vsel %vm395_vm0, %v2058_v46, %v411_v0  ;;  %v2097_v16 = vmul.f32 0.25, %v661_v62  ;;  %v412_v17 = vrot.slane %v2075_v61, 7 }
  0x6f   : > { %3170 = vst [vmem:[#allocation30_spill] sm:$0xff] %v2086_v6  ;;  %3171 = vst [vmem:[#allocation31_spill] sm:$0xff] %v2088_v9  ;;  %v878_v21 = vadd.f32 %v2086_v6, %v2060_v47  ;;  %v662_v22 = vadd.f32 %v2064_v53, %v598_v8  ;;  %v599_v24 = vmul.f32 0.25, %v481_v15  ;;  %v2105_v25 = vmul.f32 0.75, %v2075_v61  ;;  %v2140_v15 = vld [vmem:[%s1920_s11 + $0x78] sm:$0xff] }
  0x70   : > { %3172 = vst [vmem:[#allocation32_spill] sm:$0xff] %v2093_v11  ;;  %3173 = vst [vmem:[#allocation33_spill] sm:$0xff] %v2097_v16  ;;  %v879_v30 = vadd.f32 %v2093_v11, %v2072_v60  ;;  %v413_v31 = vsel %vm395_vm0, %v411_v0, %v412_v17  ;;  %v414_v36 = vrot.slane %v2091_v10, 7  ;;  %v2118_v37 = vmul.f32 0.75, %v2091_v10 }
  0x71   : > { %1367 = vst [vmem:[%s1970_s24 + $0xc0] sm:$0xff] %v877_v2  ;;  %1368 = vst [vmem:[%s1970_s24 + $0xd0] sm:$0xff] %v878_v21  ;;  %v2121_v40 = vmul.f32 0.75, %v662_v22  ;;  %v663_v44 = vadd.f32 %v2081_v1, %v599_v24  ;;  %v600_v45 = vmul.f32 0.25, %v413_v31  ;;  %v2124_v49 = vmul.f32 0.25, %v662_v22 }
  0x72   : > { %1369 = vst [vmem:[%s1970_s24 + $0x100] sm:$0xff] %v879_v30  ;;  %v482_v51 = vsel %vm395_vm0, %v2091_v10, %v414_v36  ;;  %v415_v54 = vrot.slane %v2108_v27, 7  ;;  %v2131_v56 = vmul.f32 0.75, %v2108_v27  ;;  %v417_v62 = vrot.slane %v2111_v28, 7 }
  0x73   : > { %3174 = vst [vmem:[#allocation34_spill] sm:$0xff] %v2121_v40  ;;  %3175 = vst [vmem:[#allocation35_spill] sm:$0xff] %v2124_v49  ;;  %v880_v63 = vadd.f32 %v2121_v40, %v2088_v9  ;;  %v2136_v0 = vmul.f32 0.75, %v663_v44  ;;  %v664_v2 = vadd.f32 %v2105_v25, %v600_v45  ;;  %v601_v8 = vmul.f32 0.25, %v482_v51 }
  0x74   : > { %v2142_v17 = vmul.f32 0.25, %v663_v44  ;;  %v416_v21 = vsel %vm395_vm0, %v414_v36, %v415_v54  ;;  %v483_v22 = vsel %vm395_vm0, %v2111_v28, %v417_v62  ;;  %v2148_v24 = vmul.f32 0.75, %v2111_v28  ;;  %v2157_v44 = vld [vmem:[%s1920_s11 + $0x80] sm:$0xff] }
  0x75   : > { %3176 = vst [vmem:[#allocation36_spill] sm:$0xff] %v2136_v0  ;;  %1370 = vst [vmem:[%s1970_s24 + $0x110] sm:$0xff] %v880_v63  ;;  %v881_v30 = vadd.f32 %v2136_v0, %v2097_v16  ;;  %v2153_v31 = vmul.f32 0.75, %v664_v2  ;;  %v665_v45 = vadd.f32 %v2118_v37, %v601_v8  ;;  %v602_v51 = vmul.f32 0.25, %v416_v21  ;;  %v2210_v16 = vld [vmem:[%s1920_s11 + $0xa0] sm:$0xff] }
  0x76   : > { %3177 = vst [vmem:[#allocation37_spill] sm:$0xff] %v2142_v17  ;;  %v2159_v36 = vmul.f32 0.25, %v664_v2  ;;  %v603_v54 = vmul.f32 0.25, %v483_v22  ;;  %v418_v57 = vrot.slane %v2140_v15, 7  ;;  %v2163_v43 = vmul.f32 0.75, %v2140_v15  ;;  %v2174_v2 = vld [vmem:[%s1920_s11 + $0x88] sm:$0xff] }
  0x77   : > { %3178 = vst [vmem:[#allocation38_spill] sm:$0xff] %v2153_v31  ;;  %1371 = vst [vmem:[%s1970_s24 + $0x140] sm:$0xff] %v881_v30  ;;  %v882_v63 = vadd.f32 %v2153_v31, %v2124_v49  ;;  %v2168_v0 = vmul.f32 0.75, %v665_v45  ;;  %v666_v8 = vadd.f32 %v2131_v56, %v602_v51  ;;  %v2171_v21 = vmul.f32 0.25, %v665_v45  ;;  %v2190_v49 = vld [vmem:[%s1920_s11 + $0x90] sm:$0xff] }
  0x78   : > { %3179 = vst [vmem:[#allocation39_spill] sm:$0xff] %v2159_v36  ;;  %v667_v22 = vadd.f32 %v2148_v24, %v603_v54  ;;  %v419_v40 = vsel %vm395_vm0, %v417_v62, %v418_v57  ;;  %v420_v11 = vrot.slane %v2157_v44, 7  ;;  %v2180_v30 = vmul.f32 0.75, %v2157_v44 }
  0x79   : > { %3180 = vst [vmem:[#allocation40_spill] sm:$0xff] %v2168_v0  ;;  %3181 = vst [vmem:[#allocation41_spill] sm:$0xff] %v2171_v21  ;;  %v883_v51 = vadd.f32 %v2168_v0, %v2142_v17  ;;  %v2185_v45 = vmul.f32 0.75, %v666_v8  ;;  %v604_v31 = vmul.f32 0.25, %v419_v40  ;;  %v2187_v6 = vmul.f32 0.25, %v666_v8 }
  0x7a   : > { %1372 = vst [vmem:[%s1970_s24 + $0x150] sm:$0xff] %v882_v63  ;;  %v2192_v57 = vmul.f32 0.75, %v667_v22  ;;  %v484_v62 = vsel %vm395_vm0, %v2157_v44, %v420_v11  ;;  %v2196_v54 = vmul.f32 0.25, %v667_v22  ;;  %v421_v63 = vrot.slane %v2174_v2, 7 }
  0x7b   : > { %3182 = vst [vmem:[#allocation42_spill] sm:$0xff] %v2185_v45  ;;  %3183 = vst [vmem:[#allocation43_spill] sm:$0xff] %v2187_v6  ;;  %v884_v0 = vadd.f32 %v2185_v45, %v2159_v36  ;;  %v668_v40 = vadd.f32 %v2163_v43, %v604_v31  ;;  %v605_v8 = vmul.f32 0.25, %v484_v62  ;;  %v2204_v17 = vmul.f32 0.75, %v2174_v2 }
  0x7c   : > { %3184 = vst [vmem:[#allocation44_spill] sm:$0xff] %v2192_v57  ;;  %3185 = vst [vmem:[#allocation45_spill] sm:$0xff] %v2196_v54  ;;  %v885_v22 = vadd.f32 %v2192_v57, %v2171_v21  ;;  %v422_v42 = vsel %vm395_vm0, %v420_v11, %v421_v63  ;;  %v2217_v45 = vmul.f32 0.75, %v2190_v49  ;;  %v424_v11 = vrot.slane %v2207_v55, 7 }
  0x7d   : > { %1373 = vst [vmem:[%s1970_s24 + $0x180] sm:$0xff] %v883_v51  ;;  %v423_v51 = vrot.slane %v2190_v49, 7  ;;  %1374 = vst [vmem:[%s1970_s24 + $0x190] sm:$0xff] %v884_v0  ;;  %v2220_v31 = vmul.f32 0.75, %v668_v40  ;;  %v669_v62 = vadd.f32 %v2180_v30, %v605_v8  ;;  %v606_v36 = vmul.f32 0.25, %v422_v42 }
  0x7e   : > { %v2223_v9 = vmul.f32 0.25, %v668_v40  ;;  %1375 = vst [vmem:[%s1970_s24 + $0x1c0] sm:$0xff] %v885_v22  ;;  %v2230_v63 = vmul.f32 0.75, %v2207_v55  ;;  %v426_v0 = vrot.slane %v2210_v16, 7  ;;  %v2239_v22 = vld [vmem:[%s1920_s11 + $0xa8] sm:$0xff]  ;;  %v2247_v47 = vmul.f32 0.75, %v2210_v16 }
  0x7f   : > { %3186 = vst [vmem:[#allocation46_spill] sm:$0xff] %v2220_v31  ;;  %v485_v57 = vsel %vm395_vm0, %v2190_v49, %v423_v51  ;;  %v886_v21 = vadd.f32 %v2220_v31, %v2187_v6  ;;  %v2235_v8 = vmul.f32 0.75, %v669_v62  ;;  %v670_v42 = vadd.f32 %v2204_v17, %v606_v36 }
  0x80   : > { %3187 = vst [vmem:[#allocation47_spill] sm:$0xff] %v2223_v9  ;;  %3188 = vst [vmem:[#allocation48_spill] sm:$0xff] %v2230_v63  ;;  %v607_v40 = vmul.f32 0.25, %v485_v57  ;;  %v2241_v29 = vmul.f32 0.25, %v669_v62  ;;  %v425_v60 = vsel %vm395_vm0, %v423_v51, %v424_v11  ;;  %v486_v19 = vsel %vm395_vm0, %v2210_v16, %v426_v0  ;;  %v2256_v62 = vld [vmem:[%s1920_s11 + $0xb0] sm:$0xff] }
  0x81   : > { %3189 = vst [vmem:[#allocation49_spill] sm:$0xff] %v2235_v8  ;;  %3191 = vst [vmem:[#allocation51_spill] sm:$0xff] %v2247_v47  ;;  %v887_v31 = vadd.f32 %v2235_v8, %v2196_v54  ;;  %v2252_v36 = vmul.f32 0.75, %v670_v42  ;;  %v608_v6 = vmul.f32 0.25, %v425_v60  ;;  %v2258_v51 = vmul.f32 0.25, %v670_v42  ;;  %v2273_v42 = vld [vmem:[%s1920_s11 + $0xb8] sm:$0xff] }
  0x82   : > { %3190 = vst [vmem:[#allocation50_spill] sm:$0xff] %v2241_v29  ;;  %1376 = vst [vmem:[%s1970_s24 + $0x1d0] sm:$0xff] %v886_v21  ;;  %v671_v57 = vadd.f32 %v2217_v45, %v607_v40  ;;  %v609_v11 = vmul.f32 0.25, %v486_v19  ;;  %v427_v5 = vrot.slane %v2239_v22, 7  ;;  %v2262_v33 = vmul.f32 0.75, %v2239_v22 }
  0x83   : > { %3192 = vst [vmem:[#allocation52_spill] sm:$0xff] %v2252_v36  ;;  %3193 = vst [vmem:[#allocation53_spill] sm:$0xff] %v2258_v51  ;;  %v888_v21 = vadd.f32 %v2252_v36, %v2223_v9  ;;  %v672_v60 = vadd.f32 %v2230_v63, %v608_v6  ;;  %v429_v23 = vrot.slane %v2256_v62, 7  ;;  %v2346_v63 = vmul.f32 0.75, %v2309_v34 }
  0x84   : > { %3194 = vst [vmem:[#allocation54_spill] sm:$0xff] %v2262_v33  ;;  %1377 = vst [vmem:[%s1970_s24 + $0x200] sm:$0xff] %v887_v31  ;;  %v2267_v8 = vmul.f32 0.75, %v671_v57  ;;  %v2270_v40 = vmul.f32 0.25, %v671_v57  ;;  %v673_v19 = vadd.f32 %v2247_v47, %v609_v11  ;;  %v428_v54 = vsel %vm395_vm0, %v426_v0, %v427_v5 }
  0x85   : > { %v2279_v31 = vmul.f32 0.75, %v2256_v62  ;;  %1378 = vst [vmem:[%s1970_s24 + $0x210] sm:$0xff] %v888_v21  ;;  %v2284_v57 = vmul.f32 0.75, %v672_v60  ;;  %v610_v36 = vmul.f32 0.25, %v428_v54  ;;  %v2286_v9 = vmul.f32 0.25, %v672_v60  ;;  %3213 = vst [vmem:[#allocation73_spill] sm:$0xff] %v2346_v63 }
  0x86   : > { %3195 = vst [vmem:[#allocation55_spill] sm:$0xff] %v2267_v8  ;;  %3196 = vst [vmem:[#allocation56_spill] sm:$0xff] %v2270_v40  ;;  %v889_v6 = vadd.f32 %v2267_v8, %v2241_v29  ;;  %v2291_v5 = vmul.f32 0.75, %v673_v19  ;;  %v487_v0 = vsel %vm395_vm0, %v2256_v62, %v429_v23  ;;  %v2295_v11 = vmul.f32 0.25, %v673_v19 }
  0x87   : > { %3197 = vst [vmem:[#allocation57_spill] sm:$0xff] %v2279_v31  ;;  %3198 = vst [vmem:[#allocation58_spill] sm:$0xff] %v2284_v57  ;;  %v430_v21 = vrot.slane %v2273_v42, 7  ;;  %v890_v8 = vadd.f32 %v2284_v57, %v2258_v51  ;;  %v674_v54 = vadd.f32 %v2262_v33, %v610_v36  ;;  %v611_v60 = vmul.f32 0.25, %v487_v0 }
  0x88   : > { %3199 = vst [vmem:[#allocation59_spill] sm:$0xff] %v2286_v9  ;;  %3201 = vst [vmem:[#allocation61_spill] sm:$0xff] %v2291_v5  ;;  %v2303_v29 = vmul.f32 0.75, %v2273_v42  ;;  %v891_v19 = vadd.f32 %v2291_v5, %v2270_v40  ;;  %v2316_v57 = vmul.f32 0.75, %v2289_v38 }
  0x89   : > { %3202 = vst [vmem:[#allocation62_spill] sm:$0xff] %v2295_v11  ;;  %1379 = vst [vmem:[%s1970_s24 + $0x240] sm:$0xff] %v889_v6  ;;  %v431_v47 = vsel %vm395_vm0, %v429_v23, %v430_v21  ;;  %v432_v6 = vrot.slane %v2289_v38, 7  ;;  %v2319_v36 = vmul.f32 0.75, %v674_v54  ;;  %v675_v0 = vadd.f32 %v2279_v31, %v611_v60 }
  0x8a   : > { %3203 = vst [vmem:[#allocation63_spill] sm:$0xff] %v2303_v29  ;;  %3206 = vst [vmem:[#allocation66_spill] sm:$0xff] %v2316_v57  ;;  %v612_v51 = vmul.f32 0.25, %v431_v47  ;;  %v2322_v33 = vmul.f32 0.25, %v674_v54  ;;  %v433_v23 = vrot.slane %v2306_v7, 7  ;;  %v2329_v21 = vmul.f32 0.75, %v2306_v7 }
  0x8b   : > { %1380 = vst [vmem:[%s1970_s24 + $0x250] sm:$0xff] %v890_v8  ;;  %3207 = vst [vmem:[#allocation67_spill] sm:$0xff] %v2319_v36  ;;  %v488_v5 = vsel %vm395_vm0, %v2289_v38, %v432_v6  ;;  %v435_v8 = vrot.slane %v2309_v34, 7  ;;  %v892_v40 = vadd.f32 %v2319_v36, %v2286_v9  ;;  %v2334_v60 = vmul.f32 0.75, %v675_v0 }
  0x8c   : > { %3208 = vst [vmem:[#allocation68_spill] sm:$0xff] %v2322_v33  ;;  %1381 = vst [vmem:[%s1970_s24 + $0x280] sm:$0xff] %v891_v19  ;;  %v676_v47 = vadd.f32 %v2303_v29, %v612_v51  ;;  %v613_v54 = vmul.f32 0.25, %v488_v5  ;;  %v2338_v19 = vld [vmem:[%s1920_s11 + $0xd8] sm:$0xff]  ;;  %v2340_v31 = vmul.f32 0.25, %v675_v0  ;;  %v434_v38 = vsel %vm395_vm0, %v432_v6, %v433_v23  ;;  %v2355_v0 = vld [vmem:[%s1920_s11 + $0xe0] sm:$0xff] }
  0x8d   : > { %3209 = vst [vmem:[#allocation69_spill] sm:$0xff] %v2329_v21  ;;  %3210 = vst [vmem:[#allocation70_spill] sm:$0xff] %v2334_v60  ;;  %v489_v7 = vsel %vm395_vm0, %v2309_v34, %v435_v8  ;;  %v893_v36 = vadd.f32 %v2334_v60, %v2295_v11  ;;  %v614_v9 = vmul.f32 0.25, %v434_v38  ;;  %v436_v29 = vrot.slane %v2338_v19, 7 }
  0x8e   : > { %3211 = vst [vmem:[#allocation71_spill] sm:$0xff] %v2338_v19  ;;  %3212 = vst [vmem:[#allocation72_spill] sm:$0xff] %v2340_v31  ;;  %v2351_v51 = vmul.f32 0.75, %v676_v47  ;;  %v677_v5 = vadd.f32 %v2316_v57, %v613_v54  ;;  %v2357_v6 = vmul.f32 0.25, %v676_v47  ;;  %v615_v23 = vmul.f32 0.25, %v489_v7  ;;  %v2372_v47 = vld [vmem:[%s1920_s11 + $0xe8] sm:$0xff] }
  0x8f   : > { %1382 = vst [vmem:[%s1970_s24 + $0x290] sm:$0xff] %v892_v40  ;;  %3215 = vst [vmem:[#allocation75_spill] sm:$0xff] %v2355_v0  ;;  %v2361_v34 = vmul.f32 0.75, %v2338_v19  ;;  %v678_v38 = vadd.f32 %v2329_v21, %v614_v9  ;;  %v437_v11 = vsel %vm395_vm0, %v435_v8, %v436_v29  ;;  %v438_v19 = vrot.slane %v2355_v0, 7  ;;  %v2388_v21 = vld [vmem:[%s1920_s11 + $0xf0] sm:$0xff] }
  0x90   : > { %3214 = vst [vmem:[#allocation74_spill] sm:$0xff] %v2351_v51  ;;  %3216 = vst [vmem:[#allocation76_spill] sm:$0xff] %v2357_v6  ;;  %v894_v40 = vadd.f32 %v2351_v51, %v2322_v33  ;;  %v2366_v60 = vmul.f32 0.75, %v677_v5  ;;  %v2369_v54 = vmul.f32 0.25, %v677_v5  ;;  %v679_v7 = vadd.f32 %v2346_v63, %v615_v23  ;;  %v2405_v63 = vld [vmem:[%s1920_s11 + $0xf8] sm:$0xff] }
  0x91   : > { %3217 = vst [vmem:[#allocation77_spill] sm:$0xff] %v2361_v34  ;;  %1383 = vst [vmem:[%s1970_s24 + $0x2c0] sm:$0xff] %v893_v36  ;;  %v2378_v36 = vmul.f32 0.75, %v2355_v0  ;;  %v2383_v9 = vmul.f32 0.75, %v678_v38  ;;  %v616_v5 = vmul.f32 0.25, %v437_v11  ;;  %v2385_v33 = vmul.f32 0.25, %v678_v38 }
  0x92   : > { %3218 = vst [vmem:[#allocation78_spill] sm:$0xff] %v2366_v60  ;;  %3219 = vst [vmem:[#allocation79_spill] sm:$0xff] %v2369_v54  ;;  %v895_v51 = vadd.f32 %v2366_v60, %v2340_v31  ;;  %v2390_v23 = vmul.f32 0.75, %v679_v7  ;;  %v490_v29 = vsel %vm395_vm0, %v2355_v0, %v438_v19  ;;  %v2394_v8 = vmul.f32 0.25, %v679_v7 }
  0x93   : > { %3220 = vst [vmem:[#allocation80_spill] sm:$0xff] %v2378_v36  ;;  %1384 = vst [vmem:[%s1970_s24 + $0x2d0] sm:$0xff] %v894_v40  ;;  %v439_v40 = vrot.slane %v2372_v47, 7  ;;  %v896_v60 = vadd.f32 %v2383_v9, %v2357_v6  ;;  %v680_v11 = vadd.f32 %v2361_v34, %v616_v5  ;;  %v617_v38 = vmul.f32 0.25, %v490_v29 }
  0x94   : > { %3221 = vst [vmem:[#allocation81_spill] sm:$0xff] %v2383_v9  ;;  %3222 = vst [vmem:[#allocation82_spill] sm:$0xff] %v2388_v21  ;;  %v2402_v31 = vmul.f32 0.75, %v2372_v47  ;;  %v897_v0 = vadd.f32 %v2390_v23, %v2369_v54  ;;  %v441_v57 = vrot.slane %v2388_v21, 7  ;;  %v496_v54 = vrot.slane %v1941_v20, 1 }
  0x95   : > { %3223 = vst [vmem:[#allocation83_spill] sm:$0xff] %v2390_v23  ;;  %1385 = vst [vmem:[%s1970_s24 + $0x300] sm:$0xff] %v895_v51  ;;  %v440_v7 = vsel %vm395_vm0, %v438_v19, %v439_v40  ;;  %v2412_v51 = vmul.f32 0.75, %v2388_v21  ;;  %v2415_v9 = vmul.f32 0.75, %v680_v11  ;;  %v681_v5 = vadd.f32 %v2378_v36, %v617_v38 }
  0x96   : > { %3224 = vst [vmem:[#allocation84_spill] sm:$0xff] %v2405_v63  ;;  %1386 = vst [vmem:[%s1970_s24 + $0x310] sm:$0xff] %v896_v60  ;;  %v618_v29 = vmul.f32 0.25, %v440_v7  ;;  %v2418_v6 = vmul.f32 0.25, %v680_v11  ;;  %v491_v23 = vsel %vm395_vm0, %v2388_v21, %v441_v57  ;;  %v442_v19 = vrot.slane %v2405_v63, 7 }
  0x97   : > { %3225 = vst [vmem:[#allocation85_spill] sm:$0xff] %v2415_v9  ;;  %1387 = vst [vmem:[%s1970_s24 + $0x340] sm:$0xff] %v897_v0  ;;  %v2425_v40 = vmul.f32 0.75, %v2405_v63  ;;  %v898_v60 = vadd.f32 %v2415_v9, %v2385_v33  ;;  %v2430_v34 = vmul.f32 0.75, %v681_v5  ;;  %v619_v38 = vmul.f32 0.25, %v491_v23 }
  0x98   : > { %v682_v11 = vadd.f32 %v2402_v31, %v618_v29  ;;  %v2433_v0 = vmul.f32 0.25, %v681_v5  ;;  %v443_v7 = vsel %vm395_vm0, %v441_v57, %v442_v19  ;;  %v497_v36 = vrot.slane %v1955_v41, 1 }
  0x99   : > { %3226 = vst [vmem:[#allocation86_spill] sm:$0xff] %v2430_v34  ;;  %v934_v63 = vmul.f32 0.25, %v1949_v35  ;;  %1388 = vst [vmem:[%s1970_s24 + $0x350] sm:$0xff] %v898_v60  ;;  %v899_v20 = vadd.f32 %v2430_v34, %v2394_v8  ;;  %v2444_v9 = vadd.f32 %v2412_v51, %v619_v38  ;;  %v620_v29 = vmul.f32 0.25, %v443_v7 }
  0x9a   : > { %v2441_v21 = vmul.f32 0.75, %v682_v11  ;;  %v2446_v23 = vmul.f32 0.25, %v682_v11  ;;  %v498_v5 = vsel %vm492_vm1, %v496_v54, %v497_v36  ;;  %v574_v57 = vsel %vm492_vm1, %v497_v36, %v1955_v41 }
  0x9b   : > { %v935_v35 = vmul.f32 0.25, %v1965_v48  ;;  %1389 = vst [vmem:[%s1970_s24 + $0x380] sm:$0xff] %v899_v20  ;;  %v2456_v60 = vmul.f32 0.75, %v2444_v9  ;;  %v2459_v38 = vadd.f32 %v2425_v40, %v620_v29  ;;  %v687_v11 = vmul.f32 0.25, %v498_v5 }
  0x9c   : > { %3227 = vst [vmem:[#allocation87_spill] sm:$0xff] %v2441_v21  ;;  %v900_v19 = vadd.f32 %v2441_v21, %v2418_v6  ;;  %v688_v7 = vmul.f32 0.25, %v574_v57  ;;  %v499_v54 = vrot.slane %v1968_v50, 1  ;;  %v500_v34 = vrot.slane %v1985_v59, 1 }
  0x9d   : > { %3228 = vst [vmem:[#allocation88_spill] sm:$0xff] %v2456_v60  ;;  %v502_v41 = vrot.slane %v1995_v4, 1  ;;  %v901_v48 = vadd.f32 %v2456_v60, %v2433_v0  ;;  %v2468_v36 = vmul.f32 0.75, %v2459_v38  ;;  %v719_v20 = vadd.f32 %v687_v11, %v1974_v52 }
  0x9e   : > { %1390 = vst [vmem:[%s1970_s24 + $0x390] sm:$0xff] %v900_v19  ;;  %v503_v29 = vrot.slane %v2011_v13, 1  ;;  %v720_v5 = vadd.f32 %v688_v7, %v1982_v58  ;;  %v501_v50 = vsel %vm492_vm1, %v499_v54, %v500_v34  ;;  %v575_v57 = vsel %vm492_vm1, %v500_v34, %v1985_v59 }
  0x9f   : > { %3229 = vst [vmem:[#allocation89_spill] sm:$0xff] %v2468_v36  ;;  %v505_v4 = vrot.slane %v2014_v14, 1  ;;  %1391 = vst [vmem:[%s1970_s24 + $0x3c0] sm:$0xff] %v901_v48  ;;  %v902_v19 = vadd.f32 %v2468_v36, %v2446_v23  ;;  %v2480_v60 = vmul.f32 0.75, %v719_v20  ;;  %v689_v21 = vmul.f32 0.25, %v501_v50 }
  0xa0   : > { %v2482_v52 = vmul.f32 0.25, %v719_v20  ;;  %v2484_v11 = vmul.f32 0.75, %v720_v5  ;;  %v690_v58 = vmul.f32 0.25, %v575_v57  ;;  %v2486_v7 = vmul.f32 0.25, %v720_v5 }
  0xa1   : > { %v504_v34 = vsel %vm492_vm1, %v502_v41, %v503_v29  ;;  %1392 = vst [vmem:[%s1970_s24 + $0x3d0] sm:$0xff] %v902_v19  ;;  %v994_v59 = vadd.f32 %v2480_v60, %v934_v63  ;;  %v721_v14 = vadd.f32 %v689_v21, %v1992_v3  ;;  %v576_v48 = vsel %vm492_vm1, %v503_v29, %v2011_v13 }
  0xa2   : > { %v691_v54 = vmul.f32 0.25, %v504_v34  ;;  %v995_v20 = vadd.f32 %v2484_v11, %v935_v35  ;;  %v722_v50 = vadd.f32 %v690_v58, %v2008_v12  ;;  %v692_v36 = vmul.f32 0.25, %v576_v48 }
  0xa3   : > { %v506_v5 = vrot.slane %v2041_v32, 1  ;;  %1393 = vst [vmem:[%s1970_s24 + $0x48] sm:$0xff] %v994_v59  ;;  %v2498_v57 = vmul.f32 0.75, %v721_v14  ;;  %v2501_v63 = vmul.f32 0.25, %v721_v14  ;;  %v508_v3 = vrot.slane %v2058_v46, 1 }
  0xa4   : > { %v723_v41 = vadd.f32 %v691_v54, %v2020_v18  ;;  %1394 = vst [vmem:[%s1970_s24 + $0x58] sm:$0xff] %v995_v20  ;;  %v2505_v21 = vmul.f32 0.75, %v722_v50  ;;  %v724_v13 = vadd.f32 %v692_v36, %v2033_v26  ;;  %v2508_v12 = vmul.f32 0.25, %v722_v50 }
  0xa5   : > { %v507_v35 = vsel %vm492_vm1, %v505_v4, %v506_v5  ;;  %v996_v29 = vadd.f32 %v2498_v57, %v2482_v52  ;;  %v577_v26 = vsel %vm492_vm1, %v506_v5, %v2041_v32  ;;  %v509_v54 = vrot.slane %v2075_v61, 1 }
  0xa6   : > { %v2513_v19 = vmul.f32 0.75, %v723_v41  ;;  %v693_v18 = vmul.f32 0.25, %v507_v35  ;;  %v2515_v58 = vmul.f32 0.25, %v723_v41  ;;  %v997_v46 = vadd.f32 %v2505_v21, %v2486_v7 }
  0xa7   : > { %v2519_v34 = vmul.f32 0.75, %v724_v13  ;;  %v2523_v36 = vmul.f32 0.25, %v724_v13  ;;  %1395 = vst [vmem:[%s1970_s24 + $0x88] sm:$0xff] %v996_v29  ;;  %v694_v14 = vmul.f32 0.25, %v577_v26  ;;  %v511_v20 = vrot.slane %v2091_v10, 1 }
  0xa8   : > { %v998_v4 = vadd.f32 %v2513_v19, %v2501_v63  ;;  %v725_v59 = vadd.f32 %v693_v18, %v2049_v39  ;;  %1396 = vst [vmem:[%s1970_s24 + $0x98] sm:$0xff] %v997_v46  ;;  %v512_v32 = vrot.slane %v2108_v27, 1  ;;  %v514_v50 = vrot.slane %v2111_v28, 1 }
  0xa9   : > { %v999_v48 = vadd.f32 %v2519_v34, %v2508_v12  ;;  %v726_v41 = vadd.f32 %v694_v14, %v2064_v53  ;;  %v510_v39 = vsel %vm492_vm1, %v508_v3, %v509_v54  ;;  %v578_v29 = vsel %vm492_vm1, %v509_v54, %v2075_v61 }
  0xaa   : > { %1397 = vst [vmem:[%s1970_s24 + $0xc8] sm:$0xff] %v998_v4  ;;  %v2537_v5 = vmul.f32 0.75, %v725_v59  ;;  %v2541_v13 = vmul.f32 0.25, %v725_v59  ;;  %v695_v35 = vmul.f32 0.25, %v510_v39  ;;  %v513_v10 = vsel %vm492_vm1, %v511_v20, %v512_v32 }
  0xab   : > { %1398 = vst [vmem:[%s1970_s24 + $0xd8] sm:$0xff] %v999_v48  ;;  %v579_v28 = vsel %vm492_vm1, %v512_v32, %v2108_v27  ;;  %v2551_v46 = vmul.f32 0.75, %v726_v41  ;;  %v696_v53 = vmul.f32 0.25, %v578_v29  ;;  %v2553_v3 = vmul.f32 0.25, %v726_v41 }
  0xac   : > { %v1000_v18 = vadd.f32 %v2537_v5, %v2515_v58  ;;  %v727_v26 = vadd.f32 %v695_v35, %v2081_v1  ;;  %v697_v4 = vmul.f32 0.25, %v513_v10  ;;  %v698_v59 = vmul.f32 0.25, %v579_v28 }
  0xad   : > { %v515_v61 = vrot.slane %v2140_v15, 1  ;;  %v1001_v14 = vadd.f32 %v2551_v46, %v2523_v36  ;;  %v728_v27 = vadd.f32 %v696_v53, %v2105_v25  ;;  %v517_v54 = vrot.slane %v2157_v44, 1 }
  0xae   : > { %1399 = vst [vmem:[%s1970_s24 + $0x108] sm:$0xff] %v1000_v18  ;;  %v518_v48 = vrot.slane %v2174_v2, 1  ;;  %v2563_v20 = vmul.f32 0.75, %v727_v26  ;;  %v729_v32 = vadd.f32 %v697_v4, %v2118_v37  ;;  %v2566_v1 = vmul.f32 0.25, %v727_v26 }
  0xaf   : > { %v730_v41 = vadd.f32 %v698_v59, %v2131_v56  ;;  %1400 = vst [vmem:[%s1970_s24 + $0x118] sm:$0xff] %v1001_v14  ;;  %v2570_v39 = vmul.f32 0.75, %v728_v27  ;;  %v2572_v35 = vmul.f32 0.25, %v728_v27  ;;  %v516_v25 = vsel %vm492_vm1, %v514_v50, %v515_v61 }
  0xb0   : > { %v580_v44 = vsel %vm492_vm1, %v515_v61, %v2140_v15  ;;  %v1002_v29 = vadd.f32 %v2563_v20, %v2541_v13  ;;  %v2579_v37 = vmul.f32 0.75, %v729_v32  ;;  %v699_v56 = vmul.f32 0.25, %v516_v25 }
  0xb1   : > { %v2581_v10 = vmul.f32 0.75, %v730_v41  ;;  %v1003_v28 = vadd.f32 %v2570_v39, %v2553_v3  ;;  %v2585_v18 = vmul.f32 0.25, %v729_v32  ;;  %v700_v53 = vmul.f32 0.25, %v580_v44 }
  0xb2   : > { %v2587_v50 = vmul.f32 0.25, %v730_v41  ;;  %1401 = vst [vmem:[%s1970_s24 + $0x148] sm:$0xff] %v1002_v29  ;;  %v1004_v15 = vadd.f32 %v2579_v37, %v2566_v1  ;;  %v731_v4 = vadd.f32 %v699_v56, %v2148_v24  ;;  %v519_v59 = vsel %vm492_vm1, %v517_v54, %v518_v48 }
  0xb3   : > { %v1005_v26 = vadd.f32 %v2581_v10, %v2572_v35  ;;  %1402 = vst [vmem:[%s1970_s24 + $0x158] sm:$0xff] %v1003_v28  ;;  %v732_v61 = vadd.f32 %v700_v53, %v2163_v43  ;;  %v701_v14 = vmul.f32 0.25, %v519_v59  ;;  %v581_v27 = vsel %vm492_vm1, %v518_v48, %v2174_v2 }
  0xb4   : > { %v520_v32 = vrot.slane %v2190_v49, 1  ;;  %1403 = vst [vmem:[%s1970_s24 + $0x188] sm:$0xff] %v1004_v15  ;;  %v2603_v41 = vmul.f32 0.75, %v731_v4  ;;  %v2605_v25 = vmul.f32 0.25, %v731_v4  ;;  %v702_v44 = vmul.f32 0.25, %v581_v27 }
  0xb5   : > { %1404 = vst [vmem:[%s1970_s24 + $0x198] sm:$0xff] %v1005_v26  ;;  %v521_v24 = vrot.slane %v2207_v55, 1  ;;  %v2608_v54 = vmul.f32 0.75, %v732_v61  ;;  %v733_v43 = vadd.f32 %v701_v14, %v2180_v30  ;;  %v2611_v29 = vmul.f32 0.25, %v732_v61 }
  0xb6   : > { %v523_v2 = vrot.slane %v2210_v16, 1  ;;  %v1006_v49 = vadd.f32 %v2603_v41, %v2585_v18  ;;  %v734_v48 = vadd.f32 %v702_v44, %v2204_v17  ;;  %v524_v17 = vrot.slane %v2239_v22, 1  ;;  %v3234_v44 = vld [vmem:[#allocation48_spill] sm:$0xff] }
  0xb7   : > { %3230 = vst [vmem:[#allocation90_spill] sm:$0xff] %v2608_v54  ;;  %v522_v56 = vsel %vm492_vm1, %v520_v32, %v521_v24  ;;  %v582_v28 = vsel %vm492_vm1, %v521_v24, %v2207_v55  ;;  %v1007_v53 = vadd.f32 %v2608_v54, %v2587_v50  ;;  %v2622_v15 = vmul.f32 0.75, %v733_v43 }
  0xb8   : > { %v703_v30 = vmul.f32 0.25, %v522_v56  ;;  %v2624_v26 = vmul.f32 0.25, %v733_v43  ;;  %1405 = vst [vmem:[%s1970_s24 + $0x1c8] sm:$0xff] %v1006_v49  ;;  %v2627_v16 = vmul.f32 0.75, %v734_v48  ;;  %v704_v4 = vmul.f32 0.25, %v582_v28 }
  0xb9   : > { %3231 = vst [vmem:[#allocation91_spill] sm:$0xff] %v2622_v15  ;;  %v2629_v59 = vmul.f32 0.25, %v734_v48  ;;  %1406 = vst [vmem:[%s1970_s24 + $0x1d8] sm:$0xff] %v1007_v53  ;;  %v1008_v55 = vadd.f32 %v2622_v15, %v2605_v25  ;;  %v526_v14 = vrot.slane %v2256_v62, 1  ;;  %v527_v27 = vrot.slane %v2273_v42, 1 }
  0xba   : > { %3232 = vst [vmem:[#allocation92_spill] sm:$0xff] %v2627_v16  ;;  %v735_v61 = vadd.f32 %v703_v30, %v2217_v45  ;;  %v1009_v32 = vadd.f32 %v2627_v16, %v2611_v29  ;;  %v736_v24 = vadd.f32 %v704_v4, %v3234_v44  ;;  %v525_v43 = vsel %vm492_vm1, %v523_v2, %v524_v17  ;;  %v3239_v4 = vld [vmem:[#allocation51_spill] sm:$0xff]  ;;  %v3242_v16 = vld [vmem:[#allocation64_spill] sm:$0xff] }
  0xbb   : > { %3233 = vst [vmem:[#allocation93_spill] sm:$0xff] %v2629_v59  ;;  %v583_v49 = vsel %vm492_vm1, %v524_v17, %v2239_v22  ;;  %1407 = vst [vmem:[%s1970_s24 + $0x208] sm:$0xff] %v1008_v55  ;;  %v705_v56 = vmul.f32 0.25, %v525_v43  ;;  %v528_v30 = vsel %vm492_vm1, %v526_v14, %v527_v27  ;;  %v584_v2 = vsel %vm492_vm1, %v527_v27, %v2273_v42  ;;  %v3240_v55 = vld [vmem:[#allocation54_spill] sm:$0xff]  ;;  %v3245_v27 = vld [vmem:[#allocation57_spill] sm:$0xff] }
  0xbc   : > { %v2645_v48 = vmul.f32 0.75, %v735_v61  ;;  %v2647_v45 = vmul.f32 0.25, %v735_v61  ;;  %v706_v62 = vmul.f32 0.25, %v583_v49  ;;  %1408 = vst [vmem:[%s1970_s24 + $0x218] sm:$0xff] %v1009_v32  ;;  %v2650_v28 = vmul.f32 0.75, %v736_v24 }
  0xbd   : > { %v2652_v53 = vmul.f32 0.25, %v736_v24  ;;  %v737_v17 = vadd.f32 %v705_v56, %v3239_v4  ;;  %v707_v44 = vmul.f32 0.25, %v528_v30  ;;  %v708_v43 = vmul.f32 0.25, %v584_v2  ;;  %v3241_v24 = vld [vmem:[#allocation60_spill] sm:$0xff] }
  0xbe   : > { %3235 = vst [vmem:[#allocation48_spill] sm:$0xff] %v2645_v48  ;;  %3236 = vst [vmem:[#allocation94_spill] sm:$0xff] %v2647_v45  ;;  %v1010_v22 = vadd.f32 %v2645_v48, %v2624_v26  ;;  %v738_v61 = vadd.f32 %v706_v62, %v3240_v55  ;;  %v1011_v32 = vadd.f32 %v2650_v28, %v2629_v59  ;;  %v529_v49 = vrot.slane %v3241_v24, 1  ;;  %v3247_v62 = vld [vmem:[#allocation63_spill] sm:$0xff] }
  0xbf   : > { %3237 = vst [vmem:[#allocation95_spill] sm:$0xff] %v2650_v28  ;;  %3238 = vst [vmem:[#allocation96_spill] sm:$0xff] %v2652_v53  ;;  %v530_v15 = vrot.slane %v3242_v16, 1  ;;  %v2666_v14 = vmul.f32 0.75, %v737_v17  ;;  %v739_v48 = vadd.f32 %v707_v44, %v3245_v27  ;;  %v2671_v56 = vmul.f32 0.25, %v737_v17 }
  0xc0   : > { %1409 = vst [vmem:[%s1970_s24 + $0x248] sm:$0xff] %v1010_v22  ;;  %v2668_v42 = vmul.f32 0.75, %v738_v61  ;;  %1410 = vst [vmem:[%s1970_s24 + $0x258] sm:$0xff] %v1011_v32  ;;  %v740_v30 = vadd.f32 %v708_v43, %v3247_v62  ;;  %v2675_v4 = vmul.f32 0.25, %v738_v61  ;;  %v3253_v62 = vld [vmem:[#allocation65_spill] sm:$0xff] }
  0xc1   : > { %3243 = vst [vmem:[#allocation51_spill] sm:$0xff] %v2666_v14  ;;  %3246 = vst [vmem:[#allocation60_spill] sm:$0xff] %v2671_v56  ;;  %v531_v2 = vsel %vm492_vm1, %v529_v49, %v530_v15  ;;  %v585_v22 = vsel %vm492_vm1, %v530_v15, %v3242_v16  ;;  %v1012_v55 = vadd.f32 %v2666_v14, %v2647_v45  ;;  %v2684_v44 = vmul.f32 0.75, %v739_v48  ;;  %v3252_v16 = vld [vmem:[#allocation66_spill] sm:$0xff]  ;;  %v3254_v14 = vld [vmem:[#allocation71_spill] sm:$0xff] }
  0xc2   : > { %3244 = vst [vmem:[#allocation54_spill] sm:$0xff] %v2668_v42  ;;  %3248 = vst [vmem:[#allocation64_spill] sm:$0xff] %v2675_v4  ;;  %v1013_v24 = vadd.f32 %v2668_v42, %v2652_v53  ;;  %v709_v17 = vmul.f32 0.25, %v531_v2  ;;  %v2686_v32 = vmul.f32 0.75, %v740_v30  ;;  %v2688_v43 = vmul.f32 0.25, %v739_v48  ;;  %v3255_v48 = vld [vmem:[#allocation69_spill] sm:$0xff] }
  0xc3   : > { %3249 = vst [vmem:[#allocation57_spill] sm:$0xff] %v2684_v44  ;;  %v710_v61 = vmul.f32 0.25, %v585_v22  ;;  %v2690_v27 = vmul.f32 0.25, %v740_v30  ;;  %1411 = vst [vmem:[%s1970_s24 + $0x288] sm:$0xff] %v1012_v55  ;;  %v1014_v15 = vadd.f32 %v2684_v44, %v2671_v56  ;;  %v532_v42 = vrot.slane %v3253_v62, 1  ;;  %v3256_v22 = vld [vmem:[#allocation75_spill] sm:$0xff] }
  0xc4   : > { %3250 = vst [vmem:[#allocation63_spill] sm:$0xff] %v2686_v32  ;;  %3251 = vst [vmem:[#allocation97_spill] sm:$0xff] %v2688_v43  ;;  %v741_v49 = vadd.f32 %v709_v17, %v3252_v16  ;;  %v533_v28 = vrot.slane %v3254_v14, 1  ;;  %v1015_v2 = vadd.f32 %v2686_v32, %v2675_v4  ;;  %v535_v30 = vrot.slane %v3256_v22, 1  ;;  %v3264_v56 = vld [vmem:[#allocation21_spill] sm:$0xff] }
  0xc5   : > { %1412 = vst [vmem:[%s1970_s24 + $0x298] sm:$0xff] %v1013_v24  ;;  %v742_v53 = vadd.f32 %v710_v61, %v3255_v48  ;;  %v536_v45 = vrot.slane %v2372_v47, 1  ;;  %1413 = vst [vmem:[%s1970_s24 + $0x2c8] sm:$0xff] %v1014_v15 }
  0xc6   : > { %v2705_v55 = vmul.f32 0.75, %v741_v49  ;;  %v534_v24 = vsel %vm492_vm1, %v532_v42, %v533_v28  ;;  %v2708_v17 = vmul.f32 0.25, %v741_v49  ;;  %v586_v16 = vsel %vm492_vm1, %v533_v28, %v3254_v14  ;;  %1414 = vst [vmem:[%s1970_s24 + $0x2d8] sm:$0xff] %v1015_v2  ;;  %v3259_v49 = vld [vmem:[#allocation82_spill] sm:$0xff]  ;;  %v3260_v14 = vld [vmem:[#allocation73_spill] sm:$0xff] }
  0xc7   : > { %v2713_v62 = vmul.f32 0.75, %v742_v53  ;;  %v711_v32 = vmul.f32 0.25, %v534_v24  ;;  %v712_v61 = vmul.f32 0.25, %v586_v16  ;;  %v2715_v48 = vmul.f32 0.25, %v742_v53  ;;  %v3261_v24 = vld [vmem:[#allocation77_spill] sm:$0xff] }
  0xc8   : > { %3257 = vst [vmem:[#allocation66_spill] sm:$0xff] %v2705_v55  ;;  %v1016_v15 = vadd.f32 %v2705_v55, %v2688_v43  ;;  %v537_v22 = vsel %vm492_vm1, %v535_v30, %v536_v45  ;;  %v587_v42 = vsel %vm492_vm1, %v536_v45, %v2372_v47  ;;  %v538_v44 = vrot.slane %v3259_v49, 1  ;;  %v3262_v55 = vld [vmem:[#allocation84_spill] sm:$0xff]  ;;  %v3265_v47 = vld [vmem:[#allocation17_spill] sm:$0xff]  ;;  %v3266_v45 = vld [vmem:[#allocation23_spill] sm:$0xff] }
  0xc9   : > { %3258 = vst [vmem:[#allocation65_spill] sm:$0xff] %v2713_v62  ;;  %v1017_v28 = vadd.f32 %v2713_v62, %v2690_v27  ;;  %v743_v2 = vadd.f32 %v711_v32, %v3260_v14  ;;  %v744_v4 = vadd.f32 %v712_v61, %v3261_v24  ;;  %v713_v53 = vmul.f32 0.25, %v537_v22  ;;  %v3263_v30 = vld [vmem:[#allocation16_spill] sm:$0xff] }
  0xca   : > { %1415 = vst [vmem:[%s1970_s24 + $0x308] sm:$0xff] %v1016_v15  ;;  %v714_v16 = vmul.f32 0.25, %v587_v42  ;;  %v539_v43 = vrot.slane %v3262_v55, 1  ;;  %v1056_v54 = vadd.f32 %v3264_v56, %v3263_v30  ;;  %v1057_v49 = vadd.f32 %v3266_v45, %v3265_v47  ;;  %v3268_v32 = vld [vmem:[#allocation80_spill] sm:$0xff]  ;;  %v3274_v45 = vld [vmem:[#allocation27_spill] sm:$0xff] }
  0xcb   : > { %1416 = vst [vmem:[%s1970_s24 + $0x318] sm:$0xff] %v1017_v28  ;;  %v2734_v59 = vmul.f32 0.75, %v743_v2  ;;  %v2736_v62 = vmul.f32 0.75, %v744_v4  ;;  %v745_v61 = vadd.f32 %v713_v53, %v3268_v32  ;;  %v2739_v22 = vmul.f32 0.25, %v743_v2  ;;  %v3273_v30 = vld [vmem:[#allocation20_spill] sm:$0xff] }
  0xcc   : > { %v746_v15 = vadd.f32 %v714_v16, %v2402_v31  ;;  %v2742_v42 = vmul.f32 0.25, %v744_v4  ;;  %v540_v56 = vsel %vm492_vm1, %v538_v44, %v539_v43  ;;  %v588_v14 = vsel %vm492_vm1, %v539_v43, %v3262_v55  ;;  %1423 = vst [vmem:[%s1970_s24 + $0x20] sm:$0xff] %v1056_v54  ;;  %1424 = vst [vmem:[%s1970_s24 + $0x30] sm:$0xff] %v1057_v49  ;;  %v3272_v16 = vld [vmem:[#allocation25_spill] sm:$0xff]  ;;  %v3275_v49 = vld [vmem:[#allocation22_spill] sm:$0xff] }
  0xcd   : > { %3267 = vst [vmem:[#allocation71_spill] sm:$0xff] %v2736_v62  ;;  %v1018_v28 = vadd.f32 %v2734_v59, %v2708_v17  ;;  %v1019_v24 = vadd.f32 %v2736_v62, %v2715_v48  ;;  %v2753_v2 = vmul.f32 0.75, %v745_v61  ;;  %v715_v53 = vmul.f32 0.25, %v540_v56  ;;  %v3277_v56 = vld [vmem:[#allocation29_spill] sm:$0xff]  ;;  %v3314_v62 = vld [vmem:[#allocation67_spill] sm:$0xff] }
  0xce   : > { %v2755_v31 = vmul.f32 0.75, %v746_v15  ;;  %v2757_v4 = vmul.f32 0.25, %v745_v61  ;;  %v716_v44 = vmul.f32 0.25, %v588_v14  ;;  %v2759_v43 = vmul.f32 0.25, %v746_v15  ;;  %v3278_v14 = vld [vmem:[#allocation24_spill] sm:$0xff] }
  0xcf   : > { %3269 = vst [vmem:[#allocation69_spill] sm:$0xff] %v2753_v2  ;;  %1417 = vst [vmem:[%s1970_s24 + $0x348] sm:$0xff] %v1018_v28  ;;  %v1020_v54 = vadd.f32 %v2753_v2, %v2739_v22  ;;  %v2766_v55 = vadd.f32 %v715_v53, %v2412_v51  ;;  %v1058_v47 = vadd.f32 %v3273_v30, %v3272_v16  ;;  %v3280_v51 = vld [vmem:[#allocation26_spill] sm:$0xff]  ;;  %v3282_v30 = vld [vmem:[#allocation33_spill] sm:$0xff] }
  0xd0   : > { %3270 = vst [vmem:[#allocation75_spill] sm:$0xff] %v2755_v31  ;;  %1418 = vst [vmem:[%s1970_s24 + $0x358] sm:$0xff] %v1019_v24  ;;  %v1059_v32 = vadd.f32 %v3275_v49, %v3274_v45  ;;  %v1021_v61 = vadd.f32 %v2755_v31, %v2742_v42  ;;  %v2775_v15 = vadd.f32 %v716_v44, %v2425_v40  ;;  %v3279_v24 = vld [vmem:[#allocation31_spill] sm:$0xff]  ;;  %v3283_v45 = vld [vmem:[#allocation28_spill] sm:$0xff] }
  0xd1   : > { %3271 = vst [vmem:[#allocation82_spill] sm:$0xff] %v2766_v55  ;;  %v1060_v28 = vadd.f32 %v3278_v14, %v3277_v56  ;;  %v1061_v53 = vadd.f32 %v3280_v51, %v3279_v24  ;;  %1419 = vst [vmem:[%s1970_s24 + $0x388] sm:$0xff] %v1020_v54  ;;  %v2783_v16 = vmul.f32 0.75, %v2766_v55  ;;  %v1062_v49 = vadd.f32 %v3283_v45, %v3282_v30  ;;  %v3284_v40 = vld [vmem:[#allocation35_spill] sm:$0xff]  ;;  %v3285_v44 = vld [vmem:[#allocation30_spill] sm:$0xff] }
  0xd2   : > { %3276 = vst [vmem:[#allocation73_spill] sm:$0xff] %v2775_v15  ;;  %1425 = vst [vmem:[%s1970_s24 + $0x60] sm:$0xff] %v1058_v47  ;;  %v1063_v31 = vadd.f32 %v3285_v44, %v3284_v40  ;;  %v3286_v2 = vld [vmem:[#allocation37_spill] sm:$0xff]  ;;  %v3287_v56 = vld [vmem:[#allocation32_spill] sm:$0xff]  ;;  %v2795_v54 = vmul.f32 0.75, %v2775_v15 }
  0xd3   : > { %3281 = vst [vmem:[#allocation77_spill] sm:$0xff] %v2783_v16  ;;  %1426 = vst [vmem:[%s1970_s24 + $0x70] sm:$0xff] %v1059_v32  ;;  %v1064_v14 = vadd.f32 %v3287_v56, %v3286_v2  ;;  %v3289_v47 = vld [vmem:[#allocation39_spill] sm:$0xff]  ;;  %v3290_v32 = vld [vmem:[#allocation34_spill] sm:$0xff]  ;;  %v1022_v2 = vadd.f32 %v2783_v16, %v2757_v4 }
  0xd4   : > { %1420 = vst [vmem:[%s1970_s24 + $0x398] sm:$0xff] %v1021_v61  ;;  %3288 = vst [vmem:[#allocation84_spill] sm:$0xff] %v2795_v54  ;;  %v1065_v24 = vadd.f32 %v3290_v32, %v3289_v47  ;;  %v3291_v51 = vld [vmem:[#allocation41_spill] sm:$0xff]  ;;  %v3292_v30 = vld [vmem:[#allocation36_spill] sm:$0xff] }
  0xd5   : > { %1427 = vst [vmem:[%s1970_s24 + $0xa0] sm:$0xff] %v1060_v28  ;;  %1428 = vst [vmem:[%s1970_s24 + $0xb0] sm:$0xff] %v1061_v53  ;;  %v1066_v45 = vadd.f32 %v3292_v30, %v3291_v51  ;;  %v3293_v55 = vld [vmem:[#allocation43_spill] sm:$0xff]  ;;  %v3294_v40 = vld [vmem:[#allocation38_spill] sm:$0xff] }
  0xd6   : > { %v1067_v44 = vadd.f32 %v3294_v40, %v3293_v55  ;;  %1429 = vst [vmem:[%s1970_s24 + $0xe0] sm:$0xff] %v1062_v49  ;;  %1430 = vst [vmem:[%s1970_s24 + $0xf0] sm:$0xff] %v1063_v31  ;;  %v3295_v61 = vld [vmem:[#allocation45_spill] sm:$0xff]  ;;  %v3296_v28 = vld [vmem:[#allocation40_spill] sm:$0xff]  ;;  %v1023_v55 = vadd.f32 %v2795_v54, %v2759_v43 }
  0xd7   : > { %1431 = vst [vmem:[%s1970_s24 + $0x120] sm:$0xff] %v1064_v14  ;;  %v1068_v53 = vadd.f32 %v3296_v28, %v3295_v61  ;;  %v3297_v56 = vld [vmem:[#allocation47_spill] sm:$0xff]  ;;  %v3298_v47 = vld [vmem:[#allocation42_spill] sm:$0xff]  ;;  %v3300_v30 = vld [vmem:[#allocation44_spill] sm:$0xff] }
  0xd8   : > { %v1069_v32 = vadd.f32 %v3298_v47, %v3297_v56  ;;  %v3299_v51 = vld [vmem:[#allocation50_spill] sm:$0xff]  ;;  %1432 = vst [vmem:[%s1970_s24 + $0x130] sm:$0xff] %v1065_v24  ;;  %1433 = vst [vmem:[%s1970_s24 + $0x160] sm:$0xff] %v1066_v45  ;;  %v3301_v31 = vld [vmem:[#allocation53_spill] sm:$0xff] }
  0xd9   : > { %v1070_v15 = vadd.f32 %v3300_v30, %v3299_v51  ;;  %1434 = vst [vmem:[%s1970_s24 + $0x170] sm:$0xff] %v1067_v44  ;;  %v3302_v49 = vld [vmem:[#allocation46_spill] sm:$0xff]  ;;  %v3303_v40 = vld [vmem:[#allocation56_spill] sm:$0xff]  ;;  %v3304_v61 = vld [vmem:[#allocation49_spill] sm:$0xff] }
  0xda   : > { %v1071_v14 = vadd.f32 %v3302_v49, %v3301_v31  ;;  %v1072_v28 = vadd.f32 %v3304_v61, %v3303_v40  ;;  %v3305_v56 = vld [vmem:[#allocation59_spill] sm:$0xff]  ;;  %v3306_v47 = vld [vmem:[#allocation52_spill] sm:$0xff]  ;;  %1421 = vst [vmem:[%s1970_s24 + $0x3c8] sm:$0xff] %v1022_v2  ;;  %1435 = vst [vmem:[%s1970_s24 + $0x1a0] sm:$0xff] %v1068_v53 }
  0xdb   : > { %v1073_v16 = vadd.f32 %v3306_v47, %v3305_v56  ;;  %1436 = vst [vmem:[%s1970_s24 + $0x1b0] sm:$0xff] %v1069_v32  ;;  %1437 = vst [vmem:[%s1970_s24 + $0x1e0] sm:$0xff] %v1070_v15  ;;  %v3307_v24 = vld [vmem:[#allocation62_spill] sm:$0xff]  ;;  %v3308_v45 = vld [vmem:[#allocation55_spill] sm:$0xff] }
  0xdc   : > { %v1074_v44 = vadd.f32 %v3308_v45, %v3307_v24  ;;  %v3309_v51 = vld [vmem:[#allocation68_spill] sm:$0xff]  ;;  %v3310_v30 = vld [vmem:[#allocation58_spill] sm:$0xff]  ;;  %v3312_v54 = vld [vmem:[#allocation61_spill] sm:$0xff]  ;;  %1422 = vst [vmem:[%s1970_s24 + $0x3d8] sm:$0xff] %v1023_v55 }
  0xdd   : > { %v1075_v31 = vadd.f32 %v3310_v30, %v3309_v51  ;;  %v3311_v49 = vld [vmem:[#allocation72_spill] sm:$0xff]  ;;  %1438 = vst [vmem:[%s1970_s24 + $0x1f0] sm:$0xff] %v1071_v14  ;;  %1439 = vst [vmem:[%s1970_s24 + $0x220] sm:$0xff] %v1072_v28  ;;  %v3315_v15 = vld [vmem:[#allocation79_spill] sm:$0xff] }
  0xde   : > { %v1076_v40 = vadd.f32 %v3312_v54, %v3311_v49  ;;  %v3313_v61 = vld [vmem:[#allocation76_spill] sm:$0xff]  ;;  %1440 = vst [vmem:[%s1970_s24 + $0x230] sm:$0xff] %v1073_v16  ;;  %v3316_v2 = vld [vmem:[#allocation70_spill] sm:$0xff]  ;;  %v3319_v45 = vld [vmem:[#allocation81_spill] sm:$0xff] }
  0xdf   : > { %v1077_v56 = vadd.f32 %v3314_v62, %v3313_v61  ;;  %v1078_v53 = vadd.f32 %v3316_v2, %v3315_v15  ;;  %v3317_v32 = vld [vmem:[#allocation74_spill] sm:$0xff]  ;;  %v1081_v62 = vadd.f32 %v3319_v45, %v2418_v6  ;;  %1441 = vst [vmem:[%s1970_s24 + $0x260] sm:$0xff] %v1074_v44  ;;  %1442 = vst [vmem:[%s1970_s24 + $0x270] sm:$0xff] %v1075_v31  ;;  %v3320_v16 = vld [vmem:[#allocation83_spill] sm:$0xff] }
  0xe0   : > { %v1079_v47 = vadd.f32 %v3317_v32, %v2385_v33  ;;  %v3318_v24 = vld [vmem:[#allocation78_spill] sm:$0xff]  ;;  %1443 = vst [vmem:[%s1970_s24 + $0x2a0] sm:$0xff] %v1076_v40  ;;  %v1082_v55 = vadd.f32 %v3320_v16, %v2433_v0  ;;  %v3321_v14 = vld [vmem:[#allocation85_spill] sm:$0xff]  ;;  %v1054_v33 = vmul.f32 0.25, %v2444_v9  ;;  %v3323_v51 = vld [vmem:[#allocation19_spill] sm:$0xff]  ;;  %v1122_v9 = vadd.f32 %v2484_v11, %v2508_v12 }
  0xe1   : > { %v1080_v54 = vadd.f32 %v3318_v24, %v2394_v8  ;;  %1444 = vst [vmem:[%s1970_s24 + $0x2b0] sm:$0xff] %v1077_v56  ;;  %v1083_v28 = vadd.f32 %v3321_v14, %v2446_v23  ;;  %v1055_v8 = vmul.f32 0.25, %v2459_v38  ;;  %1445 = vst [vmem:[%s1970_s24 + $0x2e0] sm:$0xff] %v1078_v53  ;;  %v3322_v6 = vld [vmem:[#allocation18_spill] sm:$0xff]  ;;  %v1120_v0 = vadd.f32 %v2486_v7, %v3323_v51  ;;  %v3325_v31 = vld [vmem:[#allocation87_spill] sm:$0xff] }
  0xe2   : > { %1446 = vst [vmem:[%s1970_s24 + $0x2f0] sm:$0xff] %v1079_v47  ;;  %1448 = vst [vmem:[%s1970_s24 + $0x330] sm:$0xff] %v1081_v62  ;;  %v1119_v44 = vadd.f32 %v2482_v52, %v3322_v6  ;;  %v1121_v23 = vadd.f32 %v2480_v60, %v2501_v63  ;;  %v3324_v38 = vld [vmem:[#allocation86_spill] sm:$0xff]  ;;  %v1123_v52 = vadd.f32 %v2498_v57, %v2515_v58  ;;  %v362_v2 = vld [vmem:[%s284_s22 + $0x8] sm:$0xff] }
  0xe3   : > { %1447 = vst [vmem:[%s1970_s24 + $0x320] sm:$0xff] %v1080_v54  ;;  %1449 = vst [vmem:[%s1970_s24 + $0x360] sm:$0xff] %v1082_v55  ;;  %v1084_v30 = vadd.f32 %v1054_v33, %v3324_v38  ;;  %v1085_v49 = vadd.f32 %v1055_v8, %v3325_v31  ;;  %v1124_v7 = vadd.f32 %v2505_v21, %v2523_v36  ;;  %v3326_v36 = vld [vmem:[#allocation93_spill] sm:$0xff]  ;;  %v3338_v61 = vld [vmem:[#allocation54_spill] sm:$0xff]  ;;  %v776_v8 = vrot.slane %v362_v2, 7 }
  0xe4   : > { %1450 = vst [vmem:[%s1970_s24 + $0x370] sm:$0xff] %v1083_v28  ;;  %1453 = vst [vmem:[%s1970_s24 + $0x28] sm:$0xff] %v1119_v44  ;;  %v1125_v60 = vadd.f32 %v2513_v19, %v2541_v13  ;;  %v1126_v11 = vadd.f32 %v2519_v34, %v2553_v3  ;;  %v1127_v57 = vadd.f32 %v2537_v5, %v2566_v1  ;;  %v3327_v5 = vld [vmem:[#allocation90_spill] sm:$0xff]  ;;  %v3329_v3 = vld [vmem:[#allocation91_spill] sm:$0xff]  ;;  %v790_v6 = vmul.f32 0.75, %v362_v2 }
  0xe5   : > { %1454 = vst [vmem:[%s1970_s24 + $0x38] sm:$0xff] %v1120_v0  ;;  %1455 = vst [vmem:[%s1970_s24 + $0x68] sm:$0xff] %v1121_v23  ;;  %v1128_v63 = vadd.f32 %v2551_v46, %v2572_v35  ;;  %v1129_v21 = vadd.f32 %v2563_v20, %v2585_v18  ;;  %v1130_v12 = vadd.f32 %v2570_v39, %v2587_v50  ;;  %v3328_v46 = vld [vmem:[#allocation94_spill] sm:$0xff]  ;;  %v3330_v1 = vld [vmem:[#allocation96_spill] sm:$0xff]  ;;  %v782_v0 = vrot.slane %v362_v2, 1 }
  0xe6   : > { %1456 = vst [vmem:[%s1970_s24 + $0x78] sm:$0xff] %v1122_v9  ;;  %1451 = vst [vmem:[%s1970_s24 + $0x3a0] sm:$0xff] %v1084_v30  ;;  %v1131_v19 = vadd.f32 %v2579_v37, %v2605_v25  ;;  %v1132_v58 = vadd.f32 %v2581_v10, %v2611_v29  ;;  %v1133_v34 = vadd.f32 %v2603_v41, %v2624_v26  ;;  %v3331_v39 = vld [vmem:[#allocation92_spill] sm:$0xff]  ;;  %v3335_v41 = vld [vmem:[#allocation95_spill] sm:$0xff] }
  0xe7   : > { %1452 = vst [vmem:[%s1970_s24 + $0x3b0] sm:$0xff] %v1085_v49  ;;  %1457 = vst [vmem:[%s1970_s24 + $0xa8] sm:$0xff] %v1123_v52  ;;  %v1134_v13 = vadd.f32 %v3327_v5, %v3326_v36  ;;  %v1135_v20 = vadd.f32 %v3329_v3, %v3328_v46  ;;  %v1136_v35 = vadd.f32 %v3331_v39, %v3330_v1  ;;  %v3332_v37 = vld [vmem:[#allocation60_spill] sm:$0xff]  ;;  %v3336_v29 = vld [vmem:[#allocation97_spill] sm:$0xff] }
  0xe8   : > { %1458 = vst [vmem:[%s1970_s24 + $0xb8] sm:$0xff] %v1124_v7  ;;  %1459 = vst [vmem:[%s1970_s24 + $0xe8] sm:$0xff] %v1125_v60  ;;  %v3333_v10 = vld [vmem:[#allocation48_spill] sm:$0xff]  ;;  %v3337_v26 = vld [vmem:[#allocation51_spill] sm:$0xff]  ;;  %v1140_v56 = vadd.f32 %v3338_v61, %v2690_v27  ;;  %v1145_v16 = vadd.f32 %v2734_v59, %v2757_v4  ;;  %v786_v49 = vsel %vm492_vm1, %v782_v0, %v362_v2 }
  0xe9   : > { %1460 = vst [vmem:[%s1970_s24 + $0xf8] sm:$0xff] %v1126_v11  ;;  %1461 = vst [vmem:[%s1970_s24 + $0x128] sm:$0xff] %v1127_v57  ;;  %v1137_v18 = vadd.f32 %v3333_v10, %v3332_v37  ;;  %v3334_v50 = vld [vmem:[#allocation64_spill] sm:$0xff]  ;;  %v1139_v40 = vadd.f32 %v3337_v26, %v3336_v29  ;;  %v3339_v53 = vld [vmem:[#allocation57_spill] sm:$0xff]  ;;  %v794_v7 = vmul.f32 0.25, %v786_v49 }
  0xea   : > { %1462 = vst [vmem:[%s1970_s24 + $0x138] sm:$0xff] %v1128_v63  ;;  %1463 = vst [vmem:[%s1970_s24 + $0x168] sm:$0xff] %v1129_v21  ;;  %v1138_v25 = vadd.f32 %v3335_v41, %v3334_v50  ;;  %v361_v15 = vld [vmem:[%s284_s22] sm:$0xff]  ;;  %v1141_v32 = vadd.f32 %v3339_v53, %v2708_v17  ;;  %v3340_v47 = vld [vmem:[#allocation63_spill] sm:$0xff] }
  0xeb   : > { %1464 = vst [vmem:[%s1970_s24 + $0x178] sm:$0xff] %v1130_v12  ;;  %1465 = vst [vmem:[%s1970_s24 + $0x1a8] sm:$0xff] %v1131_v19  ;;  %v1142_v24 = vadd.f32 %v3340_v47, %v2715_v48  ;;  %v3341_v27 = vld [vmem:[#allocation66_spill] sm:$0xff]  ;;  %v3342_v45 = vld [vmem:[#allocation65_spill] sm:$0xff]  ;;  %v781_v51 = vrot.slane %v361_v15, 1  ;;  %v796_v63 = vadd.f32 %v794_v7, %v790_v6 }
  0xec   : > { %1466 = vst [vmem:[%s1970_s24 + $0x1b8] sm:$0xff] %v1132_v58  ;;  %1467 = vst [vmem:[%s1970_s24 + $0x1e8] sm:$0xff] %v1133_v34  ;;  %v1143_v54 = vadd.f32 %v3341_v27, %v2739_v22  ;;  %v1144_v62 = vadd.f32 %v3342_v45, %v2742_v42  ;;  %v3343_v17 = vld [vmem:[#allocation71_spill] sm:$0xff]  ;;  %v3344_v14 = vld [vmem:[#allocation82_spill] sm:$0xff]  ;;  %v775_v22 = vrot.slane %v361_v15, 7  ;;  %v789_v42 = vmul.f32 0.75, %v361_v15 }
  0xed   : > { %1468 = vst [vmem:[%s1970_s24 + $0x1f8] sm:$0xff] %v1134_v13  ;;  %1469 = vst [vmem:[%s1970_s24 + $0x228] sm:$0xff] %v1135_v20  ;;  %v1146_v55 = vadd.f32 %v3343_v17, %v2759_v43  ;;  %v1117_v48 = vmul.f32 0.25, %v3344_v14  ;;  %v3345_v28 = vld [vmem:[#allocation73_spill] sm:$0xff]  ;;  %v3347_v44 = vld [vmem:[#allocation75_spill] sm:$0xff]  ;;  %v783_v31 = vsel %vm492_vm1, %v781_v51, %v782_v0  ;;  %v1187_v58 = vmul.f32 0.25, %v796_v63 }
  0xee   : > { %1470 = vst [vmem:[%s1970_s24 + $0x238] sm:$0xff] %v1136_v35  ;;  %1471 = vst [vmem:[%s1970_s24 + $0x268] sm:$0xff] %v1137_v18  ;;  %v1118_v33 = vmul.f32 0.25, %v3345_v28  ;;  %v3346_v59 = vld [vmem:[#allocation69_spill] sm:$0xff]  ;;  %v780_v23 = vsel %vm395_vm0, %v361_v15, %v775_v22  ;;  %v777_v9 = vsel %vm395_vm0, %v775_v22, %v776_v8  ;;  %v793_v52 = vmul.f32 0.25, %v783_v31  ;;  %v3348_v34 = vld [vmem:[#allocation88_spill] sm:$0xff] }
  0xef   : > { %1472 = vst [vmem:[%s1970_s24 + $0x278] sm:$0xff] %v1138_v25  ;;  %1473 = vst [vmem:[%s1970_s24 + $0x2a8] sm:$0xff] %v1139_v40  ;;  %v1147_v4 = vadd.f32 %v1117_v48, %v3346_v59  ;;  %v787_v38 = vmul.f32 0.25, %v780_v23  ;;  %v788_v30 = vmul.f32 0.25, %v777_v9  ;;  %v3349_v5 = vld [vmem:[#allocation89_spill] sm:$0xff]  ;;  %v3351_v20 = vld [vmem:[#allocation84_spill] sm:$0xff] }
  0xf0   : > { %1474 = vst [vmem:[%s1970_s24 + $0x2b8] sm:$0xff] %v1140_v56  ;;  %1475 = vst [vmem:[%s1970_s24 + $0x2e8] sm:$0xff] %v1141_v32  ;;  %v1148_v43 = vadd.f32 %v1118_v33, %v3347_v44  ;;  %v795_v57 = vadd.f32 %v793_v52, %v789_v42  ;;  %v3350_v46 = vld [vmem:[#allocation77_spill] sm:$0xff]  ;;  %v1189_v1 = vadd.f32 %v1187_v58, %v3351_v20 }
  0xf1   : > { %1476 = vst [vmem:[%s1970_s24 + $0x2f8] sm:$0xff] %v1142_v24  ;;  %1477 = vst [vmem:[%s1970_s24 + $0x328] sm:$0xff] %v1143_v54  ;;  %v791_v60 = vadd.f32 %v789_v42, %v787_v38  ;;  %v792_v11 = vadd.f32 %v790_v6, %v788_v30 }
  0xf2   : > { %1478 = vst [vmem:[%s1970_s24 + $0x338] sm:$0xff] %v1144_v62  ;;  %1479 = vst [vmem:[%s1970_s24 + $0x368] sm:$0xff] %v1145_v16  ;;  %v1186_v19 = vmul.f32 0.25, %v795_v57 }
  0xf3   : > { %1480 = vst [vmem:[%s1970_s24 + $0x378] sm:$0xff] %v1146_v55  ;;  %1481 = vst [vmem:[%s1970_s24 + $0x3a8] sm:$0xff] %v1147_v4  ;;  %v1179_v21 = vmul.f32 0.25, %v791_v60  ;;  %v1180_v12 = vmul.f32 0.25, %v792_v11 }
  0xf4   : > { %1482 = vst [vmem:[%s1970_s24 + $0x3b8] sm:$0xff] %v1148_v43  ;;  %v1188_v3 = vadd.f32 %v1186_v19, %v3350_v46  ;;  %1486 = vst [vmem:[%s1970_s24 + $0x3f8] sm:$0xff] %v1189_v1 }
  0xf5   : > { %v1181_v36 = vadd.f32 %v1179_v21, %v3348_v34  ;;  %v1182_v13 = vadd.f32 %v1180_v12, %v3349_v5 }
  0xf6   : > { %1485 = vst [vmem:[%s1970_s24 + $0x3e8] sm:$0xff] %v1188_v3 }
  0xf7   : > { %1483 = vst [vmem:[%s1970_s24 + $0x3e0] sm:$0xff] %v1181_v36  ;;  %1484 = vst [vmem:[%s1970_s24 + $0x3f0] sm:$0xff] %v1182_v13 }
  0xf8   : > { %1671 = shalt.err (!%p1668_p4)
}
  0xf9   : > { %s1672_s28 = scalar_lea.hbm %s2974_s9, 16384  ;;  %s1676_s7 = scalar_lea.hbm %s3033_s3, 32768 }
  0xfa   : > { %p1673_p5 = scmp.ne.s32.totalorder %s2974_s9, %s1672_s28  ;;  %p1677_p10 = scmp.lt.s32.totalorder %s2974_s9, %s3033_s3 }
  0xfb   : > { %p1678_p13 = scmp.lt.s32.totalorder %s1676_s7, %s1672_s28 }
  0xfc   : > { %p1674_p6 = pnand %p1673_p5, %p1827_p9 }
  0xfd   : > { %p1679_p8 = por %p1678_p13, %p1677_p10 }
  0xfe   : > { %p1675_p7 = pneg %p1674_p6 }
 0x100   : > { %p1680_p12 = pnand %p1679_p8, %p1675_p7 }
 0x102   : > { %1683 = shalt.err (!%p1680_p12)
}
 0x103   : > { %s1750_s19 = smov 256   ;;  %s1751_s21 = smov 16  }
 0x104   : > { %1504 = dma.vmem_to_hbm [thread:$0]  (%p1827_p9), %s2976_s6, 16384, %s2974_s9, %s1193_s15, %s1750_s19, %s1750_s19, %s1751_s21  }
 0x105 PF: > { %s1224_s20 = sand.u32 1, %s1722_s12   ;;  %p3352_p0 = scmp.ge.s32.totalorder %s1742_s17, 2 }
 0x106   : > { %s1225_s18 = scalar_lea.sflag [#allocation4], %s1224_s20 }
 0x107   : > { %p1517_p1 = pnand %p3352_p0, %p1834_p11 }
 0x109   : > { %p1518_p3 = pneg %p1517_p1 }
 0x10b   : > { %1717 = dma.done.wait (%p1518_p3), %s1225_s18, 16384  }
 0x10c   : > { %1719 = vsyncadd (%p1518_p3), %s1225_s18, 4294950912  ;;  %s22_s17 = sadd.s32 1, %s1742_s17   ;;  %s3353_s24 = sld [smem:[#allocation12_spill]] }
 0x10d   : > { %p19_p2 = scmp.ge.s32.totalorder %s22_s17, 4   ;;  %s3354_s14 = sld [smem:[#allocation15_spill]] }
 0x10e   : > { %s3355_s15 = sld [smem:[#allocation13_spill]]  ;;  %s3357_s12 = smov %s1726_s13 }
 0x10f   : > { %s3356_s16 = sld [smem:[#allocation14_spill]]  ;;  %21 = sbr.rel (!%p19_p2) target bundleno = 10 (0xa), region = 104 }
 0x112   : > { %s3358_s13 = smov %s3353_s24 }
 0x114   :  { %1230 = vsyncpa [#allocation3], 1 }
 0x115   :  { %1232 = vsyncpa [#allocation3 + $0x1], 1 }
 0x116   :  { %1233 = vsyncpa [#allocation6], 1 }
 0x117   :  { %1235 = vsyncpa [#allocation6 + $0x1], 1 }
 0x118   :  { %1236 = vsyncpa [#allocation4], 1 }
 0x119   :  { %1238 = vsyncpa [#allocation4 + $0x1], 1 }

</bundles_post_ra>
